<compile_context>
chip_gen: v7x
topology: tpu7x:2x2x1
jax: 0.10.0
libtpu: 0.0.40
codegen_flags: <defaults>
</compile_context>

<pallas_src>
import jax
import jax.numpy as jnp
from jax.experimental import pallas as pl
from jax.experimental.pallas import tpu as pltpu


IMG_DIMS = [(478 * 3, 400), (400, 400), (400, 200), (200, 100), (100, 50), (50, 10)]
NUM_DIMS = [(10, 5), (5, 5)]


# --------------------------------------------------------------------------
# Kernel
# --------------------------------------------------------------------------
def _lier_detect_kernel(
    # batch-tiled inputs
    x1_ref, x2_ref,
    # image_features_ : 6 Linear layers (weights bf16, biases f32)
    iw0_ref, ib0_ref, iw1_ref, ib1_ref, iw2_ref, ib2_ref,
    iw3_ref, ib3_ref, iw4_ref, ib4_ref, iw5_ref, ib5_ref,
    # numeric_features_ layer 0 (bf16 weight, f32 bias); layer 1 folded into head
    nw0_ref, nb0_ref,
    # folded head: (1,10) for image branch, (1,5) for numeric branch, (1,1) bias
    hw1_ref, hw2_ref, hb_ref,
    # output
    out_ref,
):
    def leaky_relu(v):
        # PyTorch default negative_slope = 0.01
        return jnp.where(v > 0, v, 0.01 * v)

    def linear(h, w_ref, b_ref):
        w = w_ref[...]
        # Cast the operand to the weight dtype (bf16) on the fly -- rides on
        # VPU slack under the MXU-bound matmuls -- and accumulate in f32.
        return (
            jnp.dot(h.astype(w.dtype), w, preferred_element_type=jnp.float32)
            + b_ref[...]
        )

    # ---- image branch: 1434 -> 400 -> 400 -> 200 -> 100 -> 50 -> 10 ----
    h1 = x1_ref[...]                                       # (TB, 1434) f32
    h1 = leaky_relu(linear(h1, iw0_ref, ib0_ref))
    h1 = leaky_relu(linear(h1, iw1_ref, ib1_ref))
    h1 = leaky_relu(linear(h1, iw2_ref, ib2_ref))
    h1 = leaky_relu(linear(h1, iw3_ref, ib3_ref))
    h1 = leaky_relu(linear(h1, iw4_ref, ib4_ref))
    h1 = linear(h1, iw5_ref, ib5_ref)                      # (TB, 10) f32

    # ---- numeric branch, first layer only (second layer folded into head) ----
    h2 = jnp.maximum(linear(x2_ref[...], nw0_ref, nb0_ref), 0.0)   # (TB, 5) f32

    # ---- head: concat(10,5) + Linear(15,1) expressed as VPU broadcast-mul
    #      + lane sums (no lane concat, no tiny MXU push) ----
    logits = (
        jnp.sum(h1 * hw1_ref[...], axis=-1, keepdims=True)
        + jnp.sum(h2 * hw2_ref[...], axis=-1, keepdims=True)
        + hb_ref[...]
    )                                                      # (TB, 1) f32
    out_ref[...] = jax.nn.sigmoid(logits).astype(out_ref.dtype)


# --------------------------------------------------------------------------
# Parameter construction (deterministic, synthetic) -- PyTorch module order
# --------------------------------------------------------------------------
def init_params(key):
    """Flat list: 6x(image W,b), 2x(numeric W,b), combined (W, b).

    Weights are stored transposed vs. PyTorch, i.e. (in, out): y = x @ W + b.
    MXU-facing weights (image branch + first numeric layer) are bf16; all
    biases, the second numeric layer and the head stay f32.
    """
    params = []
    for fan_in, fan_out in IMG_DIMS:
        key, wk, bk = jax.random.split(key, 3)
        w = (jax.random.normal(wk, (fan_in, fan_out), dtype=jnp.float32)
             * (1.0 / jnp.sqrt(jnp.float32(fan_in)))).astype(jnp.bfloat16)
        b = jax.random.normal(bk, (1, fan_out), dtype=jnp.float32) * 0.01
        params.extend([w, b])

    num_w_dtypes = [jnp.bfloat16, jnp.float32]   # layer0 feeds the MXU; layer1 is folded
    for (fan_in, fan_out), dt in zip(NUM_DIMS, num_w_dtypes):
        key, wk, bk = jax.random.split(key, 3)
        w = (jax.random.normal(wk, (fan_in, fan_out), dtype=jnp.float32)
             * (1.0 / jnp.sqrt(jnp.float32(fan_in)))).astype(dt)
        b = jax.random.normal(bk, (1, fan_out), dtype=jnp.float32) * 0.01
        params.extend([w, b])

    key, wk, bk = jax.random.split(key, 3)
    cw = (jax.random.normal(wk, (1, 15), dtype=jnp.float32)
          * (1.0 / jnp.sqrt(jnp.float32(15))))
    cb = jax.random.normal(bk, (1, 1), dtype=jnp.float32) * 0.01
    params.extend([cw, cb])
    return params


# --------------------------------------------------------------------------
# Wrapper
# --------------------------------------------------------------------------
def _round_up(x, m):
    return ((x + m - 1) // m) * m


def _vmem_capacity_bytes():
    try:
        return int(pltpu.get_tpu_info().vmem_capacity_bytes)
    except Exception:
        return 64 * 1024 * 1024   # conservative fallback: v7x per-TensorCore VMEM


@jax.jit
def lier_detect_forward(x1, x2, params):
    """x1: (B, 478, 3) float32, x2: (B, 10) float32 -> (B, 1) float32."""
    (iw0, ib0, iw1, ib1, iw2, ib2, iw3, ib3, iw4, ib4, iw5, ib5,
     nw0, nb0, nw1, nb1, cw, cb) = params

    batch = x1.shape[0]
    # Flatten is a metadata-only reshape; NO wrapper-side bf16 cast (the kernel
    # casts per-tile), and no input padding (ragged last block is boundary-masked).
    x1_flat = x1.reshape(batch, -1)
    x2f = x2.astype(jnp.float32)

    # Fold numeric layer 1 and the combined Linear(15,1) into the head
    # (mathematically identical):
    #   logits = h1 . cw[:, :10]
    #          + relu(x2 W0 + b0) . (cw[:,10:] W1^T)
    #          + (cb + cw[:,10:] b1^T)
    hw1 = cw[:, :10]                                       # (1, 10)
    hw2 = cw[:, 10:] @ jnp.transpose(nw1)                  # (1, 5)
    hb = cb + cw[:, 10:] @ jnp.transpose(nb1)              # (1, 1)

    # ---- per-generation tile budget ----
    vmem_cap = _vmem_capacity_bytes()
    big_vmem = vmem_cap >= 100 * 1024 * 1024               # v5e/v6e: 128 MiB; v7x: 64 MiB
    tb_cap = 2048 if big_vmem else 1024
    vmem_limit = min((96 if big_vmem else 48) * 1024 * 1024, (vmem_cap * 3) // 4)

    if batch >= 16:
        # ~ceil(batch/2) rounded to 16 sublanes => >=2 grid steps whenever it
        # matters, so v7x's two TensorCores both get work; capped by the
        # per-generation VMEM budget.
        tb = min(tb_cap, _round_up(pl.cdiv(batch, 2), 16))
    else:
        tb = batch                                         # single full-array block
    num_tiles = pl.cdiv(batch, tb)

    n_feat1 = x1_flat.shape[1]
    n_feat2 = x2f.shape[1]

    weights = [iw0, ib0, iw1, ib1, iw2, ib2, iw3, ib3, iw4, ib4, iw5, ib5,
               nw0, nb0, hw1, hw2, hb]

    def batch_spec(cols):
        return pl.BlockSpec((tb, cols), lambda i: (i, 0))

    def resident_spec(arr):
        # Constant block index -> DMA'd once, stays resident across the grid.
        return pl.BlockSpec(arr.shape, lambda i: (0, 0))

    in_specs = ([batch_spec(n_feat1), batch_spec(n_feat2)]
                + [resident_spec(w) for w in weights])

    out = pl.pallas_call(
        _lier_detect_kernel,
        out_shape=jax.ShapeDtypeStruct((num_tiles * tb, 1), jnp.float32),
        grid=(num_tiles,),
        in_specs=in_specs,
        out_specs=pl.BlockSpec((tb, 1), lambda i: (i, 0)),
        compiler_params=pltpu.CompilerParams(
            dimension_semantics=("parallel",),
            vmem_limit_bytes=vmem_limit,
        ),
    )(x1_flat, x2f, *weights)
    return out[:batch]


# --------------------------------------------------------------------------
# Pure-JAX reference (PyTorch structure: concat + Linear; same dtype choices)
# --------------------------------------------------------------------------
def _ref_forward(x1, x2, params):
    (iw0, ib0, iw1, ib1, iw2, ib2, iw3, ib3, iw4, ib4, iw5, ib5,
     nw0, nb0, nw1, nb1, cw, cb) = params

    def lin(h, w, b):
        return jnp.dot(h.astype(w.dtype), w,
                       preferred_element_type=jnp.float32) + b

    def lrelu(v):
        return jnp.where(v > 0, v, 0.01 * v)

    h1 = x1.reshape(x1.shape[0], -1)
    for w, b in [(iw0, ib0), (iw1, ib1), (iw2, ib2), (iw3, ib3), (iw4, ib4)]:
        h1 = lrelu(lin(h1, w, b))
    h1 = lin(h1, iw5, ib5)

    h2 = jnp.maximum(lin(x2.astype(jnp.float32), nw0, nb0), 0.0)
    h2 = jnp.dot(h2, nw1, preferred_element_type=jnp.float32) + nb1

    x = jnp.concatenate([h1, h2], axis=1)
    logits = jnp.dot(x, jnp.transpose(cw),
                     preferred_element_type=jnp.float32) + cb
    return jax.nn.sigmoid(logits)


# --------------------------------------------------------------------------
# Demo / smoke test
# --------------------------------------------------------------------------
if __name__ == "__main__":
    key = jax.random.PRNGKey(0)
    key, k1, k2, kp = jax.random.split(key, 4)

    batch = 2
    x1 = jax.random.normal(k1, (batch, 478, 3), dtype=jnp.float32)
    x2 = jax.random.normal(k2, (batch, 10), dtype=jnp.float32)
    params = init_params(kp)

    out = lier_detect_forward(x1, x2, params)
    jax.block_until_ready(out)

    assert out.shape == (batch, 1), out.shape
    assert bool(jnp.all((out >= 0.0) & (out <= 1.0))), "sigmoid range violated"

    ref = _ref_forward(x1, x2, params)
    assert bool(jnp.allclose(out, ref, rtol=5e-3, atol=5e-3)), (
        "mismatch vs pure-JAX reference")

    print("KERNEL_OK")
</pallas_src>

<mosaic_0001>
module attributes {stable_mosaic.version = 11 : i64} {
  func.func @_lier_detect_kernel(%arg0: i32, %arg1: memref<2x1434xf32, #tpu.memory_space<vmem>>, %arg2: memref<2x10xf32, #tpu.memory_space<vmem>>, %arg3: memref<1434x400xbf16, #tpu.memory_space<vmem>>, %arg4: memref<1x400xf32, #tpu.memory_space<vmem>>, %arg5: memref<400x400xbf16, #tpu.memory_space<vmem>>, %arg6: memref<1x400xf32, #tpu.memory_space<vmem>>, %arg7: memref<400x200xbf16, #tpu.memory_space<vmem>>, %arg8: memref<1x200xf32, #tpu.memory_space<vmem>>, %arg9: memref<200x100xbf16, #tpu.memory_space<vmem>>, %arg10: memref<1x100xf32, #tpu.memory_space<vmem>>, %arg11: memref<100x50xbf16, #tpu.memory_space<vmem>>, %arg12: memref<1x50xf32, #tpu.memory_space<vmem>>, %arg13: memref<50x10xbf16, #tpu.memory_space<vmem>>, %arg14: memref<1x10xf32, #tpu.memory_space<vmem>>, %arg15: memref<10x5xbf16, #tpu.memory_space<vmem>>, %arg16: memref<1x5xf32, #tpu.memory_space<vmem>>, %arg17: memref<1x10xf32, #tpu.memory_space<vmem>>, %arg18: memref<1x5xf32, #tpu.memory_space<vmem>>, %arg19: memref<1x1xf32, #tpu.memory_space<vmem>>, %arg20: memref<2x1xf32, #tpu.memory_space<vmem>>) attributes {dimension_semantics = [#tpu.dimension_semantics<parallel>], iteration_bounds = array<i64: 1>, scalar_prefetch = 0 : i64, scratch_operands = 0 : i64, tpu.core_type = #tpu.core_type<tc>, window_params = [{transform_indices = @transform_0, window_bounds = array<i64: 2, 1434>}, {transform_indices = @transform_1, window_bounds = array<i64: 2, 10>}, {pipeline_mode = #tpu.pipeline_mode<synchronous>, transform_indices = @transform_2, window_bounds = array<i64: 1434, 400>}, {pipeline_mode = #tpu.pipeline_mode<synchronous>, transform_indices = @transform_3, window_bounds = array<i64: 1, 400>}, {pipeline_mode = #tpu.pipeline_mode<synchronous>, transform_indices = @transform_4, window_bounds = array<i64: 400, 400>}, {pipeline_mode = #tpu.pipeline_mode<synchronous>, transform_indices = @transform_5, window_bounds = array<i64: 1, 400>}, {pipeline_mode = #tpu.pipeline_mode<synchronous>, transform_indices = @transform_6, window_bounds = array<i64: 400, 200>}, {pipeline_mode = #tpu.pipeline_mode<synchronous>, transform_indices = @transform_7, window_bounds = array<i64: 1, 200>}, {pipeline_mode = #tpu.pipeline_mode<synchronous>, transform_indices = @transform_8, window_bounds = array<i64: 200, 100>}, {pipeline_mode = #tpu.pipeline_mode<synchronous>, transform_indices = @transform_9, window_bounds = array<i64: 1, 100>}, {pipeline_mode = #tpu.pipeline_mode<synchronous>, transform_indices = @transform_10, window_bounds = array<i64: 100, 50>}, {pipeline_mode = #tpu.pipeline_mode<synchronous>, transform_indices = @transform_11, window_bounds = array<i64: 1, 50>}, {pipeline_mode = #tpu.pipeline_mode<synchronous>, transform_indices = @transform_12, window_bounds = array<i64: 50, 10>}, {pipeline_mode = #tpu.pipeline_mode<synchronous>, transform_indices = @transform_13, window_bounds = array<i64: 1, 10>}, {pipeline_mode = #tpu.pipeline_mode<synchronous>, transform_indices = @transform_14, window_bounds = array<i64: 10, 5>}, {pipeline_mode = #tpu.pipeline_mode<synchronous>, transform_indices = @transform_15, window_bounds = array<i64: 1, 5>}, {pipeline_mode = #tpu.pipeline_mode<synchronous>, transform_indices = @transform_16, window_bounds = array<i64: 1, 10>}, {pipeline_mode = #tpu.pipeline_mode<synchronous>, transform_indices = @transform_17, window_bounds = array<i64: 1, 5>}, {pipeline_mode = #tpu.pipeline_mode<synchronous>, transform_indices = @transform_18, window_bounds = array<i64: 1, 1>}, {transform_indices = @transform_19, window_bounds = array<i64: 2, 1>}]} {
    %c0 = arith.constant 0 : index
    %c0_0 = arith.constant 0 : index
    %0 = vector.load %arg1[%c0, %c0_0] : memref<2x1434xf32, #tpu.memory_space<vmem>>, vector<2x1434xf32>
    %c0_1 = arith.constant 0 : index
    %c0_2 = arith.constant 0 : index
    %1 = vector.load %arg3[%c0_1, %c0_2] : memref<1434x400xbf16, #tpu.memory_space<vmem>>, vector<1434x400xbf16>
    %2 = arith.truncf %0 : vector<2x1434xf32> to vector<2x1434xbf16>
    %cst = arith.constant dense<0.000000e+00> : vector<2x400xf32>
    %3 = tpu.matmul %2, %1, %cst {dimension_numbers = #tpu.dot_dimension_numbers<[1], [0], [0], [1], [0, 0, 1, 1], [], []>} : vector<2x1434xbf16>, vector<1434x400xbf16>, vector<2x400xf32> -> vector<2x400xf32>
    %c0_3 = arith.constant 0 : index
    %c0_4 = arith.constant 0 : index
    %4 = vector.load %arg4[%c0_3, %c0_4] : memref<1x400xf32, #tpu.memory_space<vmem>>, vector<1x400xf32>
    %5 = vector.broadcast %4 : vector<1x400xf32> to vector<2x400xf32>
    %6 = arith.addf %3, %5 : vector<2x400xf32>
    %cst_5 = arith.constant 0.000000e+00 : f32
    %7 = vector.broadcast %cst_5 : f32 to vector<2x400xf32>
    %8 = arith.cmpf ogt, %6, %7 : vector<2x400xf32>
    %cst_6 = arith.constant 0.00999999977 : f32
    %9 = vector.broadcast %cst_6 : f32 to vector<2x400xf32>
    %10 = arith.mulf %9, %6 : vector<2x400xf32>
    %11 = arith.select %8, %6, %10 : vector<2x400xi1>, vector<2x400xf32>
    %c0_7 = arith.constant 0 : index
    %c0_8 = arith.constant 0 : index
    %12 = vector.load %arg5[%c0_7, %c0_8] : memref<400x400xbf16, #tpu.memory_space<vmem>>, vector<400x400xbf16>
    %13 = arith.truncf %11 : vector<2x400xf32> to vector<2x400xbf16>
    %cst_9 = arith.constant dense<0.000000e+00> : vector<2x400xf32>
    %14 = tpu.matmul %13, %12, %cst_9 {dimension_numbers = #tpu.dot_dimension_numbers<[1], [0], [0], [1], [0, 0, 1, 1], [], []>} : vector<2x400xbf16>, vector<400x400xbf16>, vector<2x400xf32> -> vector<2x400xf32>
    %c0_10 = arith.constant 0 : index
    %c0_11 = arith.constant 0 : index
    %15 = vector.load %arg6[%c0_10, %c0_11] : memref<1x400xf32, #tpu.memory_space<vmem>>, vector<1x400xf32>
    %16 = vector.broadcast %15 : vector<1x400xf32> to vector<2x400xf32>
    %17 = arith.addf %14, %16 : vector<2x400xf32>
    %cst_12 = arith.constant 0.000000e+00 : f32
    %18 = vector.broadcast %cst_12 : f32 to vector<2x400xf32>
    %19 = arith.cmpf ogt, %17, %18 : vector<2x400xf32>
    %cst_13 = arith.constant 0.00999999977 : f32
    %20 = vector.broadcast %cst_13 : f32 to vector<2x400xf32>
    %21 = arith.mulf %20, %17 : vector<2x400xf32>
    %22 = arith.select %19, %17, %21 : vector<2x400xi1>, vector<2x400xf32>
    %c0_14 = arith.constant 0 : index
    %c0_15 = arith.constant 0 : index
    %23 = vector.load %arg7[%c0_14, %c0_15] : memref<400x200xbf16, #tpu.memory_space<vmem>>, vector<400x200xbf16>
    %24 = arith.truncf %22 : vector<2x400xf32> to vector<2x400xbf16>
    %cst_16 = arith.constant dense<0.000000e+00> : vector<2x200xf32>
    %25 = tpu.matmul %24, %23, %cst_16 {dimension_numbers = #tpu.dot_dimension_numbers<[1], [0], [0], [1], [0, 0, 1, 1], [], []>} : vector<2x400xbf16>, vector<400x200xbf16>, vector<2x200xf32> -> vector<2x200xf32>
    %c0_17 = arith.constant 0 : index
    %c0_18 = arith.constant 0 : index
    %26 = vector.load %arg8[%c0_17, %c0_18] : memref<1x200xf32, #tpu.memory_space<vmem>>, vector<1x200xf32>
    %27 = vector.broadcast %26 : vector<1x200xf32> to vector<2x200xf32>
    %28 = arith.addf %25, %27 : vector<2x200xf32>
    %cst_19 = arith.constant 0.000000e+00 : f32
    %29 = vector.broadcast %cst_19 : f32 to vector<2x200xf32>
    %30 = arith.cmpf ogt, %28, %29 : vector<2x200xf32>
    %cst_20 = arith.constant 0.00999999977 : f32
    %31 = vector.broadcast %cst_20 : f32 to vector<2x200xf32>
    %32 = arith.mulf %31, %28 : vector<2x200xf32>
    %33 = arith.select %30, %28, %32 : vector<2x200xi1>, vector<2x200xf32>
    %c0_21 = arith.constant 0 : index
    %c0_22 = arith.constant 0 : index
    %34 = vector.load %arg9[%c0_21, %c0_22] : memref<200x100xbf16, #tpu.memory_space<vmem>>, vector<200x100xbf16>
    %35 = arith.truncf %33 : vector<2x200xf32> to vector<2x200xbf16>
    %cst_23 = arith.constant dense<0.000000e+00> : vector<2x100xf32>
    %36 = tpu.matmul %35, %34, %cst_23 {dimension_numbers = #tpu.dot_dimension_numbers<[1], [0], [0], [1], [0, 0, 1, 1], [], []>} : vector<2x200xbf16>, vector<200x100xbf16>, vector<2x100xf32> -> vector<2x100xf32>
    %c0_24 = arith.constant 0 : index
    %c0_25 = arith.constant 0 : index
    %37 = vector.load %arg10[%c0_24, %c0_25] : memref<1x100xf32, #tpu.memory_space<vmem>>, vector<1x100xf32>
    %38 = vector.broadcast %37 : vector<1x100xf32> to vector<2x100xf32>
    %39 = arith.addf %36, %38 : vector<2x100xf32>
    %cst_26 = arith.constant 0.000000e+00 : f32
    %40 = vector.broadcast %cst_26 : f32 to vector<2x100xf32>
    %41 = arith.cmpf ogt, %39, %40 : vector<2x100xf32>
    %cst_27 = arith.constant 0.00999999977 : f32
    %42 = vector.broadcast %cst_27 : f32 to vector<2x100xf32>
    %43 = arith.mulf %42, %39 : vector<2x100xf32>
    %44 = arith.select %41, %39, %43 : vector<2x100xi1>, vector<2x100xf32>
    %c0_28 = arith.constant 0 : index
    %c0_29 = arith.constant 0 : index
    %45 = vector.load %arg11[%c0_28, %c0_29] : memref<100x50xbf16, #tpu.memory_space<vmem>>, vector<100x50xbf16>
    %46 = arith.truncf %44 : vector<2x100xf32> to vector<2x100xbf16>
    %cst_30 = arith.constant dense<0.000000e+00> : vector<2x50xf32>
    %47 = tpu.matmul %46, %45, %cst_30 {dimension_numbers = #tpu.dot_dimension_numbers<[1], [0], [0], [1], [0, 0, 1, 1], [], []>} : vector<2x100xbf16>, vector<100x50xbf16>, vector<2x50xf32> -> vector<2x50xf32>
    %c0_31 = arith.constant 0 : index
    %c0_32 = arith.constant 0 : index
    %48 = vector.load %arg12[%c0_31, %c0_32] : memref<1x50xf32, #tpu.memory_space<vmem>>, vector<1x50xf32>
    %49 = vector.broadcast %48 : vector<1x50xf32> to vector<2x50xf32>
    %50 = arith.addf %47, %49 : vector<2x50xf32>
    %cst_33 = arith.constant 0.000000e+00 : f32
    %51 = vector.broadcast %cst_33 : f32 to vector<2x50xf32>
    %52 = arith.cmpf ogt, %50, %51 : vector<2x50xf32>
    %cst_34 = arith.constant 0.00999999977 : f32
    %53 = vector.broadcast %cst_34 : f32 to vector<2x50xf32>
    %54 = arith.mulf %53, %50 : vector<2x50xf32>
    %55 = arith.select %52, %50, %54 : vector<2x50xi1>, vector<2x50xf32>
    %c0_35 = arith.constant 0 : index
    %c0_36 = arith.constant 0 : index
    %56 = vector.load %arg13[%c0_35, %c0_36] : memref<50x10xbf16, #tpu.memory_space<vmem>>, vector<50x10xbf16>
    %57 = arith.truncf %55 : vector<2x50xf32> to vector<2x50xbf16>
    %cst_37 = arith.constant dense<0.000000e+00> : vector<2x10xf32>
    %58 = tpu.matmul %57, %56, %cst_37 {dimension_numbers = #tpu.dot_dimension_numbers<[1], [0], [0], [1], [0, 0, 1, 1], [], []>} : vector<2x50xbf16>, vector<50x10xbf16>, vector<2x10xf32> -> vector<2x10xf32>
    %c0_38 = arith.constant 0 : index
    %c0_39 = arith.constant 0 : index
    %59 = vector.load %arg14[%c0_38, %c0_39] : memref<1x10xf32, #tpu.memory_space<vmem>>, vector<1x10xf32>
    %60 = vector.broadcast %59 : vector<1x10xf32> to vector<2x10xf32>
    %61 = arith.addf %58, %60 : vector<2x10xf32>
    %c0_40 = arith.constant 0 : index
    %c0_41 = arith.constant 0 : index
    %62 = vector.load %arg2[%c0_40, %c0_41] : memref<2x10xf32, #tpu.memory_space<vmem>>, vector<2x10xf32>
    %c0_42 = arith.constant 0 : index
    %c0_43 = arith.constant 0 : index
    %63 = vector.load %arg15[%c0_42, %c0_43] : memref<10x5xbf16, #tpu.memory_space<vmem>>, vector<10x5xbf16>
    %64 = arith.truncf %62 : vector<2x10xf32> to vector<2x10xbf16>
    %cst_44 = arith.constant dense<0.000000e+00> : vector<2x5xf32>
    %65 = tpu.matmul %64, %63, %cst_44 {dimension_numbers = #tpu.dot_dimension_numbers<[1], [0], [0], [1], [0, 0, 1, 1], [], []>} : vector<2x10xbf16>, vector<10x5xbf16>, vector<2x5xf32> -> vector<2x5xf32>
    %c0_45 = arith.constant 0 : index
    %c0_46 = arith.constant 0 : index
    %66 = vector.load %arg16[%c0_45, %c0_46] : memref<1x5xf32, #tpu.memory_space<vmem>>, vector<1x5xf32>
    %67 = vector.broadcast %66 : vector<1x5xf32> to vector<2x5xf32>
    %68 = arith.addf %65, %67 : vector<2x5xf32>
    %cst_47 = arith.constant 0.000000e+00 : f32
    %69 = vector.broadcast %cst_47 : f32 to vector<2x5xf32>
    %70 = arith.maximumf %68, %69 : vector<2x5xf32>
    %c0_48 = arith.constant 0 : index
    %c0_49 = arith.constant 0 : index
    %71 = vector.load %arg17[%c0_48, %c0_49] : memref<1x10xf32, #tpu.memory_space<vmem>>, vector<1x10xf32>
    %72 = vector.broadcast %71 : vector<1x10xf32> to vector<2x10xf32>
    %73 = arith.mulf %61, %72 : vector<2x10xf32>
    %cst_50 = arith.constant dense<0.000000e+00> : vector<2xf32>
    %74 = vector.multi_reduction <add>, %73, %cst_50 [1] : vector<2x10xf32> to vector<2xf32>
    %75 = vector.shape_cast %74 : vector<2xf32> to vector<2x1xf32>
    %c0_51 = arith.constant 0 : index
    %c0_52 = arith.constant 0 : index
    %76 = vector.load %arg18[%c0_51, %c0_52] : memref<1x5xf32, #tpu.memory_space<vmem>>, vector<1x5xf32>
    %77 = vector.broadcast %76 : vector<1x5xf32> to vector<2x5xf32>
    %78 = arith.mulf %70, %77 : vector<2x5xf32>
    %cst_53 = arith.constant dense<0.000000e+00> : vector<2xf32>
    %79 = vector.multi_reduction <add>, %78, %cst_53 [1] : vector<2x5xf32> to vector<2xf32>
    %80 = vector.shape_cast %79 : vector<2xf32> to vector<2x1xf32>
    %81 = arith.addf %75, %80 : vector<2x1xf32>
    %c0_54 = arith.constant 0 : index
    %c0_55 = arith.constant 0 : index
    %82 = vector.load %arg19[%c0_54, %c0_55] : memref<1x1xf32, #tpu.memory_space<vmem>>, vector<1x1xf32>
    %83 = vector.broadcast %82 : vector<1x1xf32> to vector<2x1xf32>
    %84 = arith.addf %81, %83 : vector<2x1xf32>
    %85 = arith.negf %84 : vector<2x1xf32>
    %86 = math.exp %85 : vector<2x1xf32>
    %cst_56 = arith.constant 1.000000e+00 : f32
    %87 = vector.broadcast %cst_56 : f32 to vector<2x1xf32>
    %88 = arith.addf %87, %86 : vector<2x1xf32>
    %89 = arith.divf %87, %88 : vector<2x1xf32>
    %c0_57 = arith.constant 0 : index
    %c0_58 = arith.constant 0 : index
    %90 = vector.load %arg20[%c0_57, %c0_58] : memref<2x1xf32, #tpu.memory_space<vmem>>, vector<2x1xf32>
    tpu.vector_store %arg20[%c0_57, %c0_58], %89 {strides = array<i32>} : memref<2x1xf32, #tpu.memory_space<vmem>>, vector<2x1xf32>,
    return
  }
  func.func @transform_0(%arg0: i32) -> (i32, i32) {
    %c0_i32 = arith.constant 0 : i32
    %c0_i32_0 = arith.constant 0 : i32
    return %arg0, %c0_i32 : i32, i32
  }
  func.func @transform_1(%arg0: i32) -> (i32, i32) {
    %c0_i32 = arith.constant 0 : i32
    %c0_i32_0 = arith.constant 0 : i32
    return %arg0, %c0_i32 : i32, i32
  }
  func.func @transform_2(%arg0: i32) -> (i32, i32) {
    %c0_i32 = arith.constant 0 : i32
    %c0_i32_0 = arith.constant 0 : i32
    %c0_i32_1 = arith.constant 0 : i32
    return %c0_i32, %c0_i32_0 : i32, i32
  }
  func.func @transform_3(%arg0: i32) -> (i32, i32) {
    %c0_i32 = arith.constant 0 : i32
    %c0_i32_0 = arith.constant 0 : i32
    %c0_i32_1 = arith.constant 0 : i32
    return %c0_i32, %c0_i32_0 : i32, i32
  }
  func.func @transform_4(%arg0: i32) -> (i32, i32) {
    %c0_i32 = arith.constant 0 : i32
    %c0_i32_0 = arith.constant 0 : i32
    %c0_i32_1 = arith.constant 0 : i32
    return %c0_i32, %c0_i32_0 : i32, i32
  }
  func.func @transform_5(%arg0: i32) -> (i32, i32) {
    %c0_i32 = arith.constant 0 : i32
    %c0_i32_0 = arith.constant 0 : i32
    %c0_i32_1 = arith.constant 0 : i32
    return %c0_i32, %c0_i32_0 : i32, i32
  }
  func.func @transform_6(%arg0: i32) -> (i32, i32) {
    %c0_i32 = arith.constant 0 : i32
    %c0_i32_0 = arith.constant 0 : i32
    %c0_i32_1 = arith.constant 0 : i32
    return %c0_i32, %c0_i32_0 : i32, i32
  }
  func.func @transform_7(%arg0: i32) -> (i32, i32) {
    %c0_i32 = arith.constant 0 : i32
    %c0_i32_0 = arith.constant 0 : i32
    %c0_i32_1 = arith.constant 0 : i32
    return %c0_i32, %c0_i32_0 : i32, i32
  }
  func.func @transform_8(%arg0: i32) -> (i32, i32) {
    %c0_i32 = arith.constant 0 : i32
    %c0_i32_0 = arith.constant 0 : i32
    %c0_i32_1 = arith.constant 0 : i32
    return %c0_i32, %c0_i32_0 : i32, i32
  }
  func.func @transform_9(%arg0: i32) -> (i32, i32) {
    %c0_i32 = arith.constant 0 : i32
    %c0_i32_0 = arith.constant 0 : i32
    %c0_i32_1 = arith.constant 0 : i32
    return %c0_i32, %c0_i32_0 : i32, i32
  }
  func.func @transform_10(%arg0: i32) -> (i32, i32) {
    %c0_i32 = arith.constant 0 : i32
    %c0_i32_0 = arith.constant 0 : i32
    %c0_i32_1 = arith.constant 0 : i32
    return %c0_i32, %c0_i32_0 : i32, i32
  }
  func.func @transform_11(%arg0: i32) -> (i32, i32) {
    %c0_i32 = arith.constant 0 : i32
    %c0_i32_0 = arith.constant 0 : i32
    %c0_i32_1 = arith.constant 0 : i32
    return %c0_i32, %c0_i32_0 : i32, i32
  }
  func.func @transform_12(%arg0: i32) -> (i32, i32) {
    %c0_i32 = arith.constant 0 : i32
    %c0_i32_0 = arith.constant 0 : i32
    %c0_i32_1 = arith.constant 0 : i32
    return %c0_i32, %c0_i32_0 : i32, i32
  }
  func.func @transform_13(%arg0: i32) -> (i32, i32) {
    %c0_i32 = arith.constant 0 : i32
    %c0_i32_0 = arith.constant 0 : i32
    %c0_i32_1 = arith.constant 0 : i32
    return %c0_i32, %c0_i32_0 : i32, i32
  }
  func.func @transform_14(%arg0: i32) -> (i32, i32) {
    %c0_i32 = arith.constant 0 : i32
    %c0_i32_0 = arith.constant 0 : i32
    %c0_i32_1 = arith.constant 0 : i32
    return %c0_i32, %c0_i32_0 : i32, i32
  }
  func.func @transform_15(%arg0: i32) -> (i32, i32) {
    %c0_i32 = arith.constant 0 : i32
    %c0_i32_0 = arith.constant 0 : i32
    %c0_i32_1 = arith.constant 0 : i32
    return %c0_i32, %c0_i32_0 : i32, i32
  }
  func.func @transform_16(%arg0: i32) -> (i32, i32) {
    %c0_i32 = arith.constant 0 : i32
    %c0_i32_0 = arith.constant 0 : i32
    %c0_i32_1 = arith.constant 0 : i32
    return %c0_i32, %c0_i32_0 : i32, i32
  }
  func.func @transform_17(%arg0: i32) -> (i32, i32) {
    %c0_i32 = arith.constant 0 : i32
    %c0_i32_0 = arith.constant 0 : i32
    %c0_i32_1 = arith.constant 0 : i32
    return %c0_i32, %c0_i32_0 : i32, i32
  }
  func.func @transform_18(%arg0: i32) -> (i32, i32) {
    %c0_i32 = arith.constant 0 : i32
    %c0_i32_0 = arith.constant 0 : i32
    %c0_i32_1 = arith.constant 0 : i32
    return %c0_i32, %c0_i32_0 : i32, i32
  }
  func.func @transform_19(%arg0: i32) -> (i32, i32) {
    %c0_i32 = arith.constant 0 : i32
    %c0_i32_0 = arith.constant 0 : i32
    return %arg0, %c0_i32 : i32, i32
  }
}

</mosaic_0001>

<bundles_post_ra>
// kernel: lier_detect_forward.1
= control target key start
LH: loop header
LB: loop body
LE: loop exit
PB: predicated region body
PF: predicated region fallthrough
CT: control target
= control target key end

     0   :  { %v5990_v36 = vmov 1983009808   ;;  %v435_v38 = vlaneseq  ;;  %vm2324_vm0 = vcmask 211968   ;;  %vm2328_vm1 = vcmask 1044480   ;;  %s7865_s2 = inlined_call_operand.vmem [shape: bf16[1434,400], index: 2, kind: input, shape index: {}]   ;;  %s7866_s0 = inlined_call_operand.vmem [shape: f32[2,1434], index: 0, kind: input, shape index: {}]   ;;  %s7867_s4 = inlined_call_operand.vmem [shape: bf16[400,400], index: 4, kind: input, shape index: {}]   ;;  %s7868_s6 = inlined_call_operand.vmem [shape: bf16[400,200], index: 6, kind: input, shape index: {}]   ;;  %s7869_s3 = inlined_call_operand.vmem [shape: f32[1,400], index: 3, kind: input, shape index: {}]   ;;  %s7870_s8 = inlined_call_operand.vmem [shape: bf16[200,100], index: 8, kind: input, shape index: {}]   ;;  %s7871_s5 = inlined_call_operand.vmem [shape: f32[1,400], index: 5, kind: input, shape index: {}]   ;;  %s7872_s10 = inlined_call_operand.vmem [shape: bf16[100,50], index: 10, kind: input, shape index: {}]   ;;  %s7873_s7 = inlined_call_operand.vmem [shape: f32[1,200], index: 7, kind: input, shape index: {}]   ;;  %s7874_s12 = inlined_call_operand.vmem [shape: bf16[50,10], index: 12, kind: input, shape index: {}]   ;;  %s7875_s9 = inlined_call_operand.vmem [shape: f32[1,100], index: 9, kind: input, shape index: {}]   ;;  %s7876_s14 = inlined_call_operand.vmem [shape: bf16[10,5], index: 14, kind: input, shape index: {}]   ;;  %s7877_s11 = inlined_call_operand.vmem [shape: f32[1,50], index: 11, kind: input, shape index: {}]   ;;  %s7878_s1 = inlined_call_operand.vmem [shape: f32[2,10], index: 1, kind: input, shape index: {}]   ;;  %s7879_s13 = inlined_call_operand.vmem [shape: f32[1,10], index: 13, kind: input, shape index: {}]   ;;  %s7880_s16 = inlined_call_operand.vmem [shape: f32[1,10], index: 16, kind: input, shape index: {}]   ;;  %s7881_s15 = inlined_call_operand.vmem [shape: f32[1,5], index: 15, kind: input, shape index: {}]   ;;  %s7882_s17 = inlined_call_operand.vmem [shape: f32[1,5], index: 17, kind: input, shape index: {}]   ;;  %s7883_s18 = inlined_call_operand.<no memory space> [shape: f32[1,1], index: 18, kind: input, shape index: {}]   ;;  %s7884_s19 = inlined_call_operand.vmem [shape: f32[2,1], index: 19, kind: output, shape index: {}]  }
   0x1   :  { %7889 = sst [smem:[#allocation3_spill]] %s7865_s2  ;;  %v433_v37 = vunpack.c.l.s4 %v5990_v36  ;;  %vm3471_vm5 = vcmask 130048   ;;  %vm4171_vm11 = vcmask 1043456   ;;  %vm4167_vm14 = vcmask 588800  }
   0x2   :  { %7890 = sst [smem:[#allocation4_spill]] %s7866_s0  ;;  %s7893_s20 = sld [smem:[#allocation3_spill]]  ;;  %v6211_v43 = vshrl.u32 %v435_v38, 7  ;;  %vm4282_vm15 = vcmask 1041408  }
   0x3   :  { %7891 = sst [smem:[#allocation5_spill]] %s7867_s4  ;;  %v434_v42 = vunpack.c.0.s8 %v433_v37  ;;  %s7894_s26 = sld [smem:[#allocation4_spill]] }
   0x4   :  { %7892 = sst [smem:[#allocation6_spill]] %s7868_s6  ;;  %s7895_s22 = sld [smem:[#allocation5_spill]] }
   0x5   :  { %v6229_v49 = vsub.s32 %v434_v42, %v6211_v43  ;;  %s7896_s23 = sld [smem:[#allocation6_spill]] }
   0x8   :  { %v5193_v0 = vld [vmem:[%s7893_s20 + $0x4] ss:$16 sps:$4 sm:$0xff]   ;;  %v5195_v1 = vld [vmem:[%s7893_s20 + $0xc] ss:$16 sps:$4 sm:$0xff]   ;;  %v5197_v2 = vld [vmem:[%s7893_s20] ss:$16 sps:$4 sm:$0xff]  }
   0x9   :  { %2341 = vmatprep.subr.bf16.mxu0 %v5193_v0  ;;  %v5198_v3 = vld [vmem:[%s7893_s20 + $0x8] ss:$16 sps:$4 sm:$0xff]   ;;  %2587 = vmatprep.subr.bf16.mxu1 %v5195_v1  ;;  %v5199_v4 = vld [vmem:[%s7893_s20 + $0x24] ss:$16 sps:$4 sm:$0xff]   ;;  %v5201_v5 = vld [vmem:[%s7893_s20 + $0x2c] ss:$16 sps:$4 sm:$0xff]  }
   0xa   :  { %2342 = vmatpush1.bf16.msra.mxu0 %v5197_v2  ;;  %2588 = vmatpush1.bf16.msra.mxu1 %v5198_v3  ;;  %v5203_v6 = vld [vmem:[%s7893_s20 + $0x20] ss:$16 sps:$4 sm:$0xff]   ;;  %v5204_v7 = vld [vmem:[%s7893_s20 + $0x28] ss:$16 sps:$4 sm:$0xff]   ;;  %v5205_v8 = vld [vmem:[%s7893_s20 + $0x44] ss:$16 sps:$4 sm:$0xff]  }
   0xb   :  { %2343 = vmatprep.subr.bf16.mxu0 %v5199_v4  ;;  %2589 = vmatprep.subr.bf16.mxu1 %v5201_v5  ;;  %v5207_v9 = vld [vmem:[%s7893_s20 + $0x4c] ss:$16 sps:$4 sm:$0xff]   ;;  %v5209_v10 = vld [vmem:[%s7893_s20 + $0x40] ss:$16 sps:$4 sm:$0xff]   ;;  %v5210_v11 = vld [vmem:[%s7893_s20 + $0x48] ss:$16 sps:$4 sm:$0xff]  }
   0xc   :  { %v5211_v12 = vld [vmem:[%s7893_s20 + $0x64] ss:$16 sps:$4 sm:$0xff]   ;;  %v5213_v13 = vld [vmem:[%s7893_s20 + $0x6c] ss:$16 sps:$4 sm:$0xff]   ;;  %v5215_v14 = vld [vmem:[%s7893_s20 + $0x60] ss:$16 sps:$4 sm:$0xff]  }
   0xd   :  { %v5216_v15 = vld [vmem:[%s7893_s20 + $0x68] ss:$16 sps:$4 sm:$0xff]   ;;  %v5217_v16 = vld [vmem:[%s7893_s20 + $0x84] ss:$16 sps:$4 sm:$0xff]   ;;  %v5219_v17 = vld [vmem:[%s7893_s20 + $0x8c] ss:$16 sps:$4 sm:$0xff]  }
   0xe   :  { %2344 = vmatpush1.bf16.msra.mxu0 %v5203_v6  ;;  %2590 = vmatpush1.bf16.msra.mxu1 %v5204_v7  ;;  %v5221_v18 = vld [vmem:[%s7893_s20 + $0x80] ss:$16 sps:$4 sm:$0xff]   ;;  %v5222_v19 = vld [vmem:[%s7893_s20 + $0x88] ss:$16 sps:$4 sm:$0xff]   ;;  %v5223_v20 = vld [vmem:[%s7893_s20 + $0xa4] ss:$16 sps:$4 sm:$0xff]  }
   0xf   :  { %2345 = vmatprep.subr.bf16.mxu0 %v5205_v8  ;;  %2591 = vmatprep.subr.bf16.mxu1 %v5207_v9  ;;  %v5225_v21 = vld [vmem:[%s7893_s20 + $0xac] ss:$16 sps:$4 sm:$0xff]   ;;  %v5227_v22 = vld [vmem:[%s7893_s20 + $0xa0] ss:$16 sps:$4 sm:$0xff]   ;;  %v5228_v23 = vld [vmem:[%s7893_s20 + $0xa8] ss:$16 sps:$4 sm:$0xff]  }
  0x10   :  { %v5229_v24 = vld [vmem:[%s7893_s20 + $0xc4] ss:$16 sps:$4 sm:$0xff]   ;;  %v5231_v25 = vld [vmem:[%s7893_s20 + $0xcc] ss:$16 sps:$4 sm:$0xff]   ;;  %v5233_v26 = vld [vmem:[%s7893_s20 + $0xc0] ss:$16 sps:$4 sm:$0xff]  }
  0x11   :  { %v5234_v27 = vld [vmem:[%s7893_s20 + $0xc8] ss:$16 sps:$4 sm:$0xff]   ;;  %v5235_v28 = vld [vmem:[%s7893_s20 + $0xe4] ss:$16 sps:$4 sm:$0xff]   ;;  %v5237_v29 = vld [vmem:[%s7893_s20 + $0xec] ss:$16 sps:$4 sm:$0xff]  }
  0x12   :  { %2346 = vmatpush1.bf16.msra.mxu0 %v5209_v10  ;;  %2592 = vmatpush1.bf16.msra.mxu1 %v5210_v11  ;;  %v5239_v30 = vld [vmem:[%s7893_s20 + $0xe0] ss:$16 sps:$4 sm:$0xff]   ;;  %v5240_v31 = vld [vmem:[%s7893_s20 + $0xe8] ss:$16 sps:$4 sm:$0xff]   ;;  %v5241_v32 = vld [vmem:[%s7893_s20 + $0x104] ss:$16 sps:$4 sm:$0xff]  }
  0x13   :  { %2347 = vmatprep.subr.bf16.mxu0 %v5211_v12  ;;  %2593 = vmatprep.subr.bf16.mxu1 %v5213_v13  ;;  %v5243_v33 = vld [vmem:[%s7893_s20 + $0x10c] ss:$16 sps:$4 sm:$0xff]   ;;  %v5245_v34 = vld [vmem:[%s7893_s20 + $0x100] ss:$16 sps:$4 sm:$0xff]   ;;  %v5246_v35 = vld [vmem:[%s7893_s20 + $0x108] ss:$16 sps:$4 sm:$0xff]  }
  0x14   :  { %v5247_v39 = vld [vmem:[%s7893_s20 + $0x124] ss:$16 sps:$4 sm:$0xff]   ;;  %v5249_v40 = vld [vmem:[%s7893_s20 + $0x12c] ss:$16 sps:$4 sm:$0xff]   ;;  %v5251_v41 = vld [vmem:[%s7893_s20 + $0x120] ss:$16 sps:$4 sm:$0xff]  }
  0x15   :  { %v5252_v44 = vld [vmem:[%s7893_s20 + $0x128] ss:$16 sps:$4 sm:$0xff]   ;;  %v5253_v45 = vld [vmem:[%s7893_s20 + $0x144] ss:$16 sps:$4 sm:$0xff]   ;;  %v5255_v46 = vld [vmem:[%s7893_s20 + $0x14c] ss:$16 sps:$4 sm:$0xff]  }
  0x16   :  { %2348 = vmatpush1.bf16.msra.mxu0 %v5215_v14  ;;  %2594 = vmatpush1.bf16.msra.mxu1 %v5216_v15  ;;  %v5257_v47 = vld [vmem:[%s7893_s20 + $0x140] ss:$16 sps:$4 sm:$0xff]   ;;  %v5258_v48 = vld [vmem:[%s7893_s20 + $0x148] ss:$16 sps:$4 sm:$0xff]   ;;  %v5259_v50 = vld [vmem:[%s7893_s20 + $0x164] ss:$16 sps:$4 sm:$0xff]  }
  0x17   :  { %2349 = vmatprep.subr.bf16.mxu0 %v5217_v16  ;;  %2595 = vmatprep.subr.bf16.mxu1 %v5219_v17  ;;  %v5261_v51 = vld [vmem:[%s7893_s20 + $0x16c] ss:$16 sps:$4 sm:$0xff]   ;;  %v65_v52 = vld [vmem:[%s7894_s26] sm:$0xff]  ;;  %v5264_v55 = vld [vmem:[%s7893_s20 + $0x168] ss:$16 sps:$4 sm:$0xff]  }
  0x18   :  { %v5263_v53 = vld [vmem:[%s7893_s20 + $0x160] ss:$16 sps:$4 sm:$0xff]   ;;  %v438_v54 = vrot.slane %v65_v52, %v6229_v49  ;;  %v5265_v56 = vld [vmem:[%s7893_s20 + $0x184] ss:$16 sps:$4 sm:$0xff]   ;;  %v5267_v57 = vld [vmem:[%s7893_s20 + $0x18c] ss:$16 sps:$4 sm:$0xff]   ;;  %v431_v4 = vcombine.high %v65_v52, %v65_v52 }
  0x19   :  { %v5269_v59 = vld [vmem:[%s7893_s20 + $0x180] ss:$16 sps:$4 sm:$0xff]   ;;  %v5270_v61 = vld [vmem:[%s7893_s20 + $0x188] ss:$16 sps:$4 sm:$0xff]   ;;  %v5271_v62 = vld [vmem:[%s7893_s20 + $0x1a4] ss:$16 sps:$4 sm:$0xff]  }
  0x1a   :  { %2350 = vmatpush1.bf16.msra.mxu0 %v5221_v18  ;;  %2596 = vmatpush1.bf16.msra.mxu1 %v5222_v19  ;;  %v446_v58 = vcombine.high %v438_v54, %v438_v54  ;;  %v5273_v63 = vld [vmem:[%s7893_s20 + $0x1ac] ss:$16 sps:$4 sm:$0xff]   ;;  %v5275_v0 = vld [vmem:[%s7893_s20 + $0x1a0] ss:$16 sps:$4 sm:$0xff]   ;;  %v5276_v1 = vld [vmem:[%s7893_s20 + $0x1a8] ss:$16 sps:$4 sm:$0xff]   ;;  %v6290_v9 = vrot.slane %v431_v4, %v6229_v49  ;;  %v494_v16 = vpack.c.bf16 %v438_v54, %v438_v54 }
  0x1b   :  { %2351 = vmatprep.subr.bf16.mxu0 %v5223_v20  ;;  %2597 = vmatprep.subr.bf16.mxu1 %v5225_v21  ;;  %v5277_v2 = vld [vmem:[%s7893_s20 + $0x1c4] ss:$16 sps:$4 sm:$0xff]   ;;  %v5279_v3 = vld [vmem:[%s7893_s20 + $0x1cc] ss:$16 sps:$4 sm:$0xff]   ;;  %v5281_v5 = vld [vmem:[%s7893_s20 + $0x1c0] ss:$16 sps:$4 sm:$0xff]  }
  0x1c   :  { %v495_v60 = vpack.c.bf16 %v446_v58, %v446_v58  ;;  %v5282_v6 = vld [vmem:[%s7893_s20 + $0x1c8] ss:$16 sps:$4 sm:$0xff]   ;;  %v5283_v7 = vld [vmem:[%s7893_s20 + $0x1e4] ss:$16 sps:$4 sm:$0xff]   ;;  %v5285_v8 = vld [vmem:[%s7893_s20 + $0x1ec] ss:$16 sps:$4 sm:$0xff]   ;;  %v447_v14 = vcombine.high %v6290_v9, %v6290_v9 }
  0x1d   :  { %v5287_v10 = vld [vmem:[%s7893_s20 + $0x1e0] ss:$16 sps:$4 sm:$0xff]   ;;  %v5288_v11 = vld [vmem:[%s7893_s20 + $0x1e8] ss:$16 sps:$4 sm:$0xff]   ;;  %v5292_v12 = vld [vmem:[%s7893_s20 + $0x204] ss:$16 sps:$4 sm:$0xff]  }
  0x1e   :  { %2352 = vmatpush1.bf16.msra.mxu0 %v5227_v22  ;;  %2598 = vmatpush1.bf16.msra.mxu1 %v5228_v23  ;;  %v5295_v13 = vld [vmem:[%s7893_s20 + $0x20c] ss:$16 sps:$4 sm:$0xff]   ;;  %v5290_v15 = vld [vmem:[%s7893_s20 + $0x200] ss:$16 sps:$4 sm:$0xff]   ;;  %v5293_v17 = vld [vmem:[%s7893_s20 + $0x208] ss:$16 sps:$4 sm:$0xff]   ;;  %v497_v20 = vpack.c.bf16 %v447_v14, %v447_v14 }
  0x1f   :  { %2353 = vmatprep.subr.bf16.mxu0 %v5229_v24  ;;  %2599 = vmatprep.subr.bf16.mxu1 %v5231_v25  ;;  %v5298_v18 = vld [vmem:[%s7893_s20 + $0x224] ss:$16 sps:$4 sm:$0xff]   ;;  %v5301_v19 = vld [vmem:[%s7893_s20 + $0x22c] ss:$16 sps:$4 sm:$0xff]   ;;  %v5296_v21 = vld [vmem:[%s7893_s20 + $0x220] ss:$16 sps:$4 sm:$0xff]  }
  0x20   :  { %2373 = vmatprep.mubr.bf16.mxu0 %v495_v60  ;;  %2619 = vmatprep.mubr.bf16.mxu1 %v495_v60  ;;  %v5299_v22 = vld [vmem:[%s7893_s20 + $0x228] ss:$16 sps:$4 sm:$0xff]   ;;  %v5304_v23 = vld [vmem:[%s7893_s20 + $0x244] ss:$16 sps:$4 sm:$0xff]   ;;  %v5307_v24 = vld [vmem:[%s7893_s20 + $0x24c] ss:$16 sps:$4 sm:$0xff]  }
  0x21   :  { %v5302_v25 = vld [vmem:[%s7893_s20 + $0x240] ss:$16 sps:$4 sm:$0xff]   ;;  %v5325_v36 = vld [vmem:[%s7893_s20 + $0x2ac] ss:$16 sps:$4 sm:$0xff]   ;;  %v5323_v38 = vld [vmem:[%s7893_s20 + $0x2a8] ss:$16 sps:$4 sm:$0xff]  }
  0x22   :  { %2354 = vmatpush1.bf16.msra.mxu0 %v5233_v26  ;;  %2600 = vmatpush1.bf16.msra.mxu1 %v5234_v27  ;;  %v5305_v26 = vld [vmem:[%s7893_s20 + $0x248] ss:$16 sps:$4 sm:$0xff]   ;;  %v5310_v27 = vld [vmem:[%s7893_s20 + $0x264] ss:$16 sps:$4 sm:$0xff]   ;;  %v5320_v37 = vld [vmem:[%s7893_s20 + $0x2a0] ss:$16 sps:$4 sm:$0xff]  }
  0x23   :  { %2355 = vmatprep.subr.bf16.mxu0 %v5235_v28  ;;  %2601 = vmatprep.subr.bf16.mxu1 %v5237_v29  ;;  %v5313_v28 = vld [vmem:[%s7893_s20 + $0x26c] ss:$16 sps:$4 sm:$0xff]   ;;  %v5308_v29 = vld [vmem:[%s7893_s20 + $0x260] ss:$16 sps:$4 sm:$0xff]   ;;  %v5329_v42 = vld [vmem:[%s7893_s20 + $0x2c8] ss:$16 sps:$4 sm:$0xff]  }
  0x24   :  { %v5341_v52 = vld [vmem:[%s7893_s20 + $0x308] ss:$16 sps:$4 sm:$0xff]   ;;  %v5349_v54 = vld [vmem:[%s7893_s20 + $0x32c] ss:$16 sps:$4 sm:$0xff]   ;;  %v5382_v14 = vld [vmem:[%s7893_s20 + $0x3e4] ss:$16 sps:$4 sm:$0xff]  }
  0x25   :  { %v5355_v58 = vld [vmem:[%s7893_s20 + $0x34c] ss:$16 sps:$4 sm:$0xff]   ;;  %v5353_v60 = vld [vmem:[%s7893_s20 + $0x348] ss:$16 sps:$4 sm:$0xff]  }
  0x26   :  { %2356 = vmatpush1.bf16.msra.mxu0 %v5239_v30  ;;  %2602 = vmatpush1.bf16.msra.mxu1 %v5240_v31  ;;  %v5311_v30 = vld [vmem:[%s7893_s20 + $0x268] ss:$16 sps:$4 sm:$0xff]   ;;  %v5316_v31 = vld [vmem:[%s7893_s20 + $0x284] ss:$16 sps:$4 sm:$0xff]  }
  0x27   :  { %2357 = vmatprep.subr.bf16.mxu0 %v5241_v32  ;;  %2603 = vmatprep.subr.bf16.mxu1 %v5243_v33  ;;  %v5319_v32 = vld [vmem:[%s7893_s20 + $0x28c] ss:$16 sps:$4 sm:$0xff]   ;;  %v5314_v33 = vld [vmem:[%s7893_s20 + $0x280] ss:$16 sps:$4 sm:$0xff]   ;;  %v5365_v4 = vld [vmem:[%s7893_s20 + $0x388] ss:$16 sps:$4 sm:$0xff]  }
  0x2a   :  { %2358 = vmatpush1.bf16.msra.mxu0 %v5245_v34  ;;  %2604 = vmatpush1.bf16.msra.mxu1 %v5246_v35  ;;  %v5317_v34 = vld [vmem:[%s7893_s20 + $0x288] ss:$16 sps:$4 sm:$0xff]   ;;  %v5322_v35 = vld [vmem:[%s7893_s20 + $0x2a4] ss:$16 sps:$4 sm:$0xff]  }
  0x2b   :  { %2359 = vmatprep.subr.bf16.mxu0 %v5247_v39  ;;  %2605 = vmatprep.subr.bf16.mxu1 %v5249_v40  ;;  %v5328_v39 = vld [vmem:[%s7893_s20 + $0x2c4] ss:$16 sps:$4 sm:$0xff]   ;;  %v5331_v40 = vld [vmem:[%s7893_s20 + $0x2cc] ss:$16 sps:$4 sm:$0xff]  }
  0x2e   :  { %2360 = vmatpush1.bf16.msra.mxu0 %v5251_v41  ;;  %2606 = vmatpush1.bf16.msra.mxu1 %v5252_v44  ;;  %v5326_v41 = vld [vmem:[%s7893_s20 + $0x2c0] ss:$16 sps:$4 sm:$0xff]   ;;  %v5334_v44 = vld [vmem:[%s7893_s20 + $0x2e4] ss:$16 sps:$4 sm:$0xff]  }
  0x2f   :  { %2361 = vmatprep.subr.bf16.mxu0 %v5253_v45  ;;  %2607 = vmatprep.subr.bf16.mxu1 %v5255_v46  ;;  %v5337_v45 = vld [vmem:[%s7893_s20 + $0x2ec] ss:$16 sps:$4 sm:$0xff]   ;;  %v5332_v46 = vld [vmem:[%s7893_s20 + $0x2e0] ss:$16 sps:$4 sm:$0xff]  }
  0x32   :  { %2362 = vmatpush1.bf16.msra.mxu0 %v5257_v47  ;;  %2608 = vmatpush1.bf16.msra.mxu1 %v5258_v48  ;;  %v5335_v47 = vld [vmem:[%s7893_s20 + $0x2e8] ss:$16 sps:$4 sm:$0xff]   ;;  %v5340_v48 = vld [vmem:[%s7893_s20 + $0x304] ss:$16 sps:$4 sm:$0xff]  }
  0x33   :  { %2363 = vmatprep.subr.bf16.mxu0 %v5259_v50  ;;  %2609 = vmatprep.subr.bf16.mxu1 %v5261_v51  ;;  %v5343_v50 = vld [vmem:[%s7893_s20 + $0x30c] ss:$16 sps:$4 sm:$0xff]   ;;  %v5338_v51 = vld [vmem:[%s7893_s20 + $0x300] ss:$16 sps:$4 sm:$0xff]  }
  0x36   :  { %2364 = vmatpush1.bf16.msra.mxu0 %v5263_v53  ;;  %2610 = vmatpush1.bf16.msra.mxu1 %v5264_v55  ;;  %v5346_v53 = vld [vmem:[%s7893_s20 + $0x324] ss:$16 sps:$4 sm:$0xff]   ;;  %v5344_v55 = vld [vmem:[%s7893_s20 + $0x320] ss:$16 sps:$4 sm:$0xff]  }
  0x37   :  { %2365 = vmatprep.subr.bf16.mxu0 %v5265_v56  ;;  %2611 = vmatprep.subr.bf16.mxu1 %v5267_v57  ;;  %v5347_v56 = vld [vmem:[%s7893_s20 + $0x328] ss:$16 sps:$4 sm:$0xff]   ;;  %v5352_v57 = vld [vmem:[%s7893_s20 + $0x344] ss:$16 sps:$4 sm:$0xff]  }
  0x3a   :  { %2366 = vmatpush1.bf16.msra.mxu0 %v5269_v59  ;;  %2612 = vmatpush1.bf16.msra.mxu1 %v5270_v61  ;;  %v5350_v59 = vld [vmem:[%s7893_s20 + $0x340] ss:$16 sps:$4 sm:$0xff]   ;;  %v5358_v61 = vld [vmem:[%s7893_s20 + $0x364] ss:$16 sps:$4 sm:$0xff]  }
  0x3b   :  { %2367 = vmatprep.subr.bf16.mxu0 %v5271_v62  ;;  %2613 = vmatprep.subr.bf16.mxu1 %v5273_v63  ;;  %v5361_v62 = vld [vmem:[%s7893_s20 + $0x36c] ss:$16 sps:$4 sm:$0xff]   ;;  %v5356_v63 = vld [vmem:[%s7893_s20 + $0x360] ss:$16 sps:$4 sm:$0xff]  }
  0x3e   :  { %2368 = vmatpush1.bf16.msra.mxu0 %v5275_v0  ;;  %2614 = vmatpush1.bf16.msra.mxu1 %v5276_v1  ;;  %v5359_v0 = vld [vmem:[%s7893_s20 + $0x368] ss:$16 sps:$4 sm:$0xff]   ;;  %v5364_v1 = vld [vmem:[%s7893_s20 + $0x384] ss:$16 sps:$4 sm:$0xff]  }
  0x3f   :  { %2369 = vmatprep.subr.bf16.mxu0 %v5277_v2  ;;  %2615 = vmatprep.subr.bf16.mxu1 %v5279_v3  ;;  %v5367_v2 = vld [vmem:[%s7893_s20 + $0x38c] ss:$16 sps:$4 sm:$0xff]   ;;  %v5362_v3 = vld [vmem:[%s7893_s20 + $0x380] ss:$16 sps:$4 sm:$0xff]  }
  0x42   :  { %2370 = vmatpush1.bf16.msra.mxu0 %v5281_v5  ;;  %2616 = vmatpush1.bf16.msra.mxu1 %v5282_v6  ;;  %v5370_v5 = vld [vmem:[%s7893_s20 + $0x3a4] ss:$16 sps:$4 sm:$0xff]   ;;  %v5373_v6 = vld [vmem:[%s7893_s20 + $0x3ac] ss:$16 sps:$4 sm:$0xff]  }
  0x43   :  { %2371 = vmatprep.subr.bf16.mxu0 %v5283_v7  ;;  %2617 = vmatprep.subr.bf16.mxu1 %v5285_v8  ;;  %v5368_v7 = vld [vmem:[%s7893_s20 + $0x3a0] ss:$16 sps:$4 sm:$0xff]   ;;  %v5371_v8 = vld [vmem:[%s7893_s20 + $0x3a8] ss:$16 sps:$4 sm:$0xff]  }
  0x46   :  { %2372 = vmatpush1.bf16.msra.mxu0 %v5287_v10  ;;  %2618 = vmatpush1.bf16.msra.mxu1 %v5288_v11  ;;  %v5376_v10 = vld [vmem:[%s7893_s20 + $0x3c4] ss:$16 sps:$4 sm:$0xff]   ;;  %v5379_v11 = vld [vmem:[%s7893_s20 + $0x3cc] ss:$16 sps:$4 sm:$0xff]  }
  0x47   :  { %2382 = vmatprep.subr.bf16.mxu0 %v5292_v12  ;;  %2628 = vmatprep.subr.bf16.mxu1 %v5295_v13  ;;  %v5374_v12 = vld [vmem:[%s7893_s20 + $0x3c0] ss:$16 sps:$4 sm:$0xff]   ;;  %v5377_v13 = vld [vmem:[%s7893_s20 + $0x3c8] ss:$16 sps:$4 sm:$0xff]  }
  0x49   :  { %2374 = vmatmul.mubr.bf16.vlgmr.msra.gmra.mrb[0].mxu0 %v494_v16  ;;  %2620 = vmatmul.mubr.bf16.vlgmr.msra.gmra.mrb[0].mxu1 %v494_v16  ;;  %v5380_v16 = vld [vmem:[%s7893_s20 + $0x3e0] ss:$16 sps:$4 sm:$0xff]  }
  0x4a   :  { %2383 = vmatpush1.bf16.msra.mxu0 %v5290_v15  ;;  %2629 = vmatpush1.bf16.msra.mxu1 %v5293_v17  ;;  %v5385_v15 = vld [vmem:[%s7893_s20 + $0x3ec] ss:$16 sps:$4 sm:$0xff]   ;;  %v5383_v17 = vld [vmem:[%s7893_s20 + $0x3e8] ss:$16 sps:$4 sm:$0xff]  }
  0x4b   :  { %2384 = vmatprep.subr.bf16.mxu0 %v5298_v18  ;;  %2630 = vmatprep.subr.bf16.mxu1 %v5301_v19  ;;  %v5388_v18 = vld [vmem:[%s7893_s20 + $0x404] ss:$16 sps:$4 sm:$0xff]   ;;  %v5391_v19 = vld [vmem:[%s7893_s20 + $0x40c] ss:$16 sps:$4 sm:$0xff]  }
  0x4c   :  { %2414 = vmatprep.mubr.bf16.mxu0 %v497_v20  ;;  %2660 = vmatprep.mubr.bf16.mxu1 %v497_v20  ;;  %v5386_v20 = vld [vmem:[%s7893_s20 + $0x400] ss:$16 sps:$4 sm:$0xff]  }
  0x4e   :  { %2385 = vmatpush1.bf16.msra.mxu0 %v5296_v21  ;;  %2631 = vmatpush1.bf16.msra.mxu1 %v5299_v22  ;;  %v496_v21 = vpack.c.bf16 %v6290_v9, %v6290_v9  ;;  %v5389_v22 = vld [vmem:[%s7893_s20 + $0x408] ss:$16 sps:$4 sm:$0xff]   ;;  %v5397_v9 = vld [vmem:[%s7893_s20 + $0x42c] ss:$16 sps:$4 sm:$0xff]  }
  0x4f   :  { %2386 = vmatprep.subr.bf16.mxu0 %v5304_v23  ;;  %2632 = vmatprep.subr.bf16.mxu1 %v5307_v24  ;;  %v6509_v23 = vld [vmem:[%s7894_s26 + $0x8] sm:$0xff]  ;;  %v5394_v24 = vld [vmem:[%s7893_s20 + $0x424] ss:$16 sps:$4 sm:$0xff]  }
  0x52   :  { %2387 = vmatpush1.bf16.msra.mxu0 %v5302_v25  ;;  %2633 = vmatpush1.bf16.msra.mxu1 %v5305_v26  ;;  %v6519_v25 = vrot.slane %v6509_v23, %v6229_v49 }
  0x53   :  { %2388 = vmatprep.subr.bf16.mxu0 %v5310_v27  ;;  %2634 = vmatprep.subr.bf16.mxu1 %v5313_v28  ;;  %v5392_v27 = vld [vmem:[%s7893_s20 + $0x420] ss:$16 sps:$4 sm:$0xff]   ;;  %v5395_v28 = vld [vmem:[%s7893_s20 + $0x428] ss:$16 sps:$4 sm:$0xff]  }
  0x54   :  { %v463_v26 = vcombine.high %v6519_v25, %v6519_v25 }
  0x56   :  { %2389 = vmatpush1.bf16.msra.mxu0 %v5308_v29  ;;  %2635 = vmatpush1.bf16.msra.mxu1 %v5311_v30  ;;  %v5400_v29 = vld [vmem:[%s7893_s20 + $0x444] ss:$16 sps:$4 sm:$0xff]   ;;  %v5403_v30 = vld [vmem:[%s7893_s20 + $0x44c] ss:$16 sps:$4 sm:$0xff]  }
  0x57   :  { %2390 = vmatprep.subr.bf16.mxu0 %v5316_v31  ;;  %2636 = vmatprep.subr.bf16.mxu1 %v5319_v32  ;;  %v499_v31 = vpack.c.bf16 %v463_v26, %v463_v26  ;;  %v5398_v32 = vld [vmem:[%s7893_s20 + $0x440] ss:$16 sps:$4 sm:$0xff]   ;;  %v5479_v26 = vld [vmem:[%s7893_s20 + $0x5e8] ss:$16 sps:$4 sm:$0xff]  }
  0x5a   :  { %2391 = vmatpush1.bf16.msra.mxu0 %v5314_v33  ;;  %2637 = vmatpush1.bf16.msra.mxu1 %v5317_v34  ;;  %v5401_v33 = vld [vmem:[%s7893_s20 + $0x448] ss:$16 sps:$4 sm:$0xff]   ;;  %v5406_v34 = vld [vmem:[%s7893_s20 + $0x464] ss:$16 sps:$4 sm:$0xff]  }
  0x5b   :  { %2392 = vmatprep.subr.bf16.mxu0 %v5322_v35  ;;  %2638 = vmatprep.subr.bf16.mxu1 %v5325_v36  ;;  %v5409_v35 = vld [vmem:[%s7893_s20 + $0x46c] ss:$16 sps:$4 sm:$0xff]   ;;  %v5404_v36 = vld [vmem:[%s7893_s20 + $0x460] ss:$16 sps:$4 sm:$0xff]  }
  0x5e   :  { %2393 = vmatpush1.bf16.msra.mxu0 %v5320_v37  ;;  %2639 = vmatpush1.bf16.msra.mxu1 %v5323_v38  ;;  %v5407_v37 = vld [vmem:[%s7893_s20 + $0x468] ss:$16 sps:$4 sm:$0xff]   ;;  %v5412_v38 = vld [vmem:[%s7893_s20 + $0x484] ss:$16 sps:$4 sm:$0xff]  }
  0x5f   :  { %2394 = vmatprep.subr.bf16.mxu0 %v5328_v39  ;;  %2640 = vmatprep.subr.bf16.mxu1 %v5331_v40  ;;  %v5415_v39 = vld [vmem:[%s7893_s20 + $0x48c] ss:$16 sps:$4 sm:$0xff]   ;;  %v5410_v40 = vld [vmem:[%s7893_s20 + $0x480] ss:$16 sps:$4 sm:$0xff]  }
  0x62   :  { %2395 = vmatpush1.bf16.msra.mxu0 %v5326_v41  ;;  %2641 = vmatpush1.bf16.msra.mxu1 %v5329_v42  ;;  %v5413_v41 = vld [vmem:[%s7893_s20 + $0x488] ss:$16 sps:$4 sm:$0xff]   ;;  %v5418_v42 = vld [vmem:[%s7893_s20 + $0x4a4] ss:$16 sps:$4 sm:$0xff]  }
  0x63   :  { %2396 = vmatprep.subr.bf16.mxu0 %v5334_v44  ;;  %2642 = vmatprep.subr.bf16.mxu1 %v5337_v45  ;;  %v5421_v44 = vld [vmem:[%s7893_s20 + $0x4ac] ss:$16 sps:$4 sm:$0xff]   ;;  %v5416_v45 = vld [vmem:[%s7893_s20 + $0x4a0] ss:$16 sps:$4 sm:$0xff]  }
  0x66   :  { %2397 = vmatpush1.bf16.msra.mxu0 %v5332_v46  ;;  %2643 = vmatpush1.bf16.msra.mxu1 %v5335_v47  ;;  %v5419_v46 = vld [vmem:[%s7893_s20 + $0x4a8] ss:$16 sps:$4 sm:$0xff]   ;;  %v5424_v47 = vld [vmem:[%s7893_s20 + $0x4c4] ss:$16 sps:$4 sm:$0xff]  }
  0x67   :  { %2398 = vmatprep.subr.bf16.mxu0 %v5340_v48  ;;  %2644 = vmatprep.subr.bf16.mxu1 %v5343_v50  ;;  %v5427_v48 = vld [vmem:[%s7893_s20 + $0x4cc] ss:$16 sps:$4 sm:$0xff]   ;;  %v5422_v50 = vld [vmem:[%s7893_s20 + $0x4c0] ss:$16 sps:$4 sm:$0xff]  }
  0x6a   :  { %2399 = vmatpush1.bf16.msra.mxu0 %v5338_v51  ;;  %2645 = vmatpush1.bf16.msra.mxu1 %v5341_v52  ;;  %v5425_v51 = vld [vmem:[%s7893_s20 + $0x4c8] ss:$16 sps:$4 sm:$0xff]   ;;  %v5430_v52 = vld [vmem:[%s7893_s20 + $0x4e4] ss:$16 sps:$4 sm:$0xff]  }
  0x6b   :  { %2400 = vmatprep.subr.bf16.mxu0 %v5346_v53  ;;  %2646 = vmatprep.subr.bf16.mxu1 %v5349_v54  ;;  %v5433_v53 = vld [vmem:[%s7893_s20 + $0x4ec] ss:$16 sps:$4 sm:$0xff]   ;;  %v5428_v54 = vld [vmem:[%s7893_s20 + $0x4e0] ss:$16 sps:$4 sm:$0xff]  }
  0x6e   :  { %2401 = vmatpush1.bf16.msra.mxu0 %v5344_v55  ;;  %2647 = vmatpush1.bf16.msra.mxu1 %v5347_v56  ;;  %v5431_v55 = vld [vmem:[%s7893_s20 + $0x4e8] ss:$16 sps:$4 sm:$0xff]   ;;  %v5436_v56 = vld [vmem:[%s7893_s20 + $0x504] ss:$16 sps:$4 sm:$0xff]  }
  0x6f   :  { %2402 = vmatprep.subr.bf16.mxu0 %v5352_v57  ;;  %2648 = vmatprep.subr.bf16.mxu1 %v5355_v58  ;;  %v5439_v57 = vld [vmem:[%s7893_s20 + $0x50c] ss:$16 sps:$4 sm:$0xff]   ;;  %v5434_v58 = vld [vmem:[%s7893_s20 + $0x500] ss:$16 sps:$4 sm:$0xff]  }
  0x72   :  { %2403 = vmatpush1.bf16.msra.mxu0 %v5350_v59  ;;  %2649 = vmatpush1.bf16.msra.mxu1 %v5353_v60  ;;  %v5437_v59 = vld [vmem:[%s7893_s20 + $0x508] ss:$16 sps:$4 sm:$0xff]   ;;  %v5442_v60 = vld [vmem:[%s7893_s20 + $0x524] ss:$16 sps:$4 sm:$0xff]  }
  0x73   :  { %2404 = vmatprep.subr.bf16.mxu0 %v5358_v61  ;;  %2650 = vmatprep.subr.bf16.mxu1 %v5361_v62  ;;  %v5445_v61 = vld [vmem:[%s7893_s20 + $0x52c] ss:$16 sps:$4 sm:$0xff]   ;;  %v5440_v62 = vld [vmem:[%s7893_s20 + $0x520] ss:$16 sps:$4 sm:$0xff]  }
  0x76   :  { %2405 = vmatpush1.bf16.msra.mxu0 %v5356_v63  ;;  %2651 = vmatpush1.bf16.msra.mxu1 %v5359_v0  ;;  %v5443_v63 = vld [vmem:[%s7893_s20 + $0x528] ss:$16 sps:$4 sm:$0xff]   ;;  %v5448_v0 = vld [vmem:[%s7893_s20 + $0x544] ss:$16 sps:$4 sm:$0xff]  }
  0x77   :  { %2406 = vmatprep.subr.bf16.mxu0 %v5364_v1  ;;  %2652 = vmatprep.subr.bf16.mxu1 %v5367_v2  ;;  %v5451_v1 = vld [vmem:[%s7893_s20 + $0x54c] ss:$16 sps:$4 sm:$0xff]   ;;  %v5446_v2 = vld [vmem:[%s7893_s20 + $0x540] ss:$16 sps:$4 sm:$0xff]  }
  0x7a   :  { %2407 = vmatpush1.bf16.msra.mxu0 %v5362_v3  ;;  %2653 = vmatpush1.bf16.msra.mxu1 %v5365_v4  ;;  %v5449_v3 = vld [vmem:[%s7893_s20 + $0x548] ss:$16 sps:$4 sm:$0xff]   ;;  %v5454_v4 = vld [vmem:[%s7893_s20 + $0x564] ss:$16 sps:$4 sm:$0xff]  }
  0x7b   :  { %2408 = vmatprep.subr.bf16.mxu0 %v5370_v5  ;;  %2654 = vmatprep.subr.bf16.mxu1 %v5373_v6  ;;  %v5457_v5 = vld [vmem:[%s7893_s20 + $0x56c] ss:$16 sps:$4 sm:$0xff]   ;;  %v5452_v6 = vld [vmem:[%s7893_s20 + $0x560] ss:$16 sps:$4 sm:$0xff]  }
  0x7e   :  { %2409 = vmatpush1.bf16.msra.mxu0 %v5368_v7  ;;  %2655 = vmatpush1.bf16.msra.mxu1 %v5371_v8  ;;  %v5455_v7 = vld [vmem:[%s7893_s20 + $0x568] ss:$16 sps:$4 sm:$0xff]   ;;  %v5460_v8 = vld [vmem:[%s7893_s20 + $0x584] ss:$16 sps:$4 sm:$0xff]  }
  0x7f   :  { %2410 = vmatprep.subr.bf16.mxu0 %v5376_v10  ;;  %2656 = vmatprep.subr.bf16.mxu1 %v5379_v11  ;;  %v5463_v10 = vld [vmem:[%s7893_s20 + $0x58c] ss:$16 sps:$4 sm:$0xff]   ;;  %v5458_v11 = vld [vmem:[%s7893_s20 + $0x580] ss:$16 sps:$4 sm:$0xff]  }
  0x82   :  { %2411 = vmatpush1.bf16.msra.mxu0 %v5374_v12  ;;  %2657 = vmatpush1.bf16.msra.mxu1 %v5377_v13  ;;  %v5461_v12 = vld [vmem:[%s7893_s20 + $0x588] ss:$16 sps:$4 sm:$0xff]   ;;  %v5466_v13 = vld [vmem:[%s7893_s20 + $0x5a4] ss:$16 sps:$4 sm:$0xff]  }
  0x83   :  { %2412 = vmatprep.subr.bf16.mxu0 %v5382_v14  ;;  %2658 = vmatprep.subr.bf16.mxu1 %v5385_v15  ;;  %v5469_v14 = vld [vmem:[%s7893_s20 + $0x5ac] ss:$16 sps:$4 sm:$0xff]   ;;  %v5464_v15 = vld [vmem:[%s7893_s20 + $0x5a0] ss:$16 sps:$4 sm:$0xff]  }
  0x86   :  { %2413 = vmatpush1.bf16.msra.mxu0 %v5380_v16  ;;  %2659 = vmatpush1.bf16.msra.mxu1 %v5383_v17  ;;  %v5467_v16 = vld [vmem:[%s7893_s20 + $0x5a8] ss:$16 sps:$4 sm:$0xff]   ;;  %v5472_v17 = vld [vmem:[%s7893_s20 + $0x5c4] ss:$16 sps:$4 sm:$0xff]  }
  0x87   :  { %2423 = vmatprep.subr.bf16.mxu0 %v5388_v18  ;;  %2669 = vmatprep.subr.bf16.mxu1 %v5391_v19  ;;  %v5475_v18 = vld [vmem:[%s7893_s20 + $0x5cc] ss:$16 sps:$4 sm:$0xff]   ;;  %v448_v19 = vcombine.high %v6509_v23, %v6509_v23 }
  0x88   :  { %v5481_v23 = vld [vmem:[%s7893_s20 + $0x5ec] ss:$16 sps:$4 sm:$0xff]  }
  0x89   :  { %2415 = vmatmul.mubr.bf16.vlgmr.msra.gmra.mrb[0].mxu0 %v496_v21  ;;  %2661 = vmatmul.mubr.bf16.vlgmr.msra.gmra.mrb[0].mxu1 %v496_v21  ;;  %v5473_v21 = vld [vmem:[%s7893_s20 + $0x5c8] ss:$16 sps:$4 sm:$0xff]  }
  0x8a   :  { %2424 = vmatpush1.bf16.msra.mxu0 %v5386_v20  ;;  %2670 = vmatpush1.bf16.msra.mxu1 %v5389_v22  ;;  %v5470_v20 = vld [vmem:[%s7893_s20 + $0x5c0] ss:$16 sps:$4 sm:$0xff]   ;;  %v5478_v22 = vld [vmem:[%s7893_s20 + $0x5e4] ss:$16 sps:$4 sm:$0xff]  }
  0x8b   :  { %2425 = vmatprep.subr.bf16.mxu0 %v5394_v24  ;;  %2671 = vmatprep.subr.bf16.mxu1 %v5397_v9  ;;  %v6694_v24 = vrot.slane %v448_v19, %v6229_v49  ;;  %v5476_v9 = vld [vmem:[%s7893_s20 + $0x5e0] ss:$16 sps:$4 sm:$0xff]   ;;  %v5557_v19 = vld [vmem:[%s7893_s20 + $0x788] ss:$16 sps:$4 sm:$0xff]  }
  0x8c   :  { %2455 = vmatprep.mubr.bf16.mxu0 %v499_v31  ;;  %2701 = vmatprep.mubr.bf16.mxu1 %v499_v31  ;;  %v5482_v31 = vld [vmem:[%s7893_s20 + $0x600] ss:$16 sps:$4 sm:$0xff]  }
  0x8e   :  { %2426 = vmatpush1.bf16.msra.mxu0 %v5392_v27  ;;  %2672 = vmatpush1.bf16.msra.mxu1 %v5395_v28  ;;  %v5484_v27 = vld [vmem:[%s7893_s20 + $0x604] ss:$16 sps:$4 sm:$0xff]   ;;  %v5487_v28 = vld [vmem:[%s7893_s20 + $0x60c] ss:$16 sps:$4 sm:$0xff]  }
  0x8f   :  { %2427 = vmatprep.subr.bf16.mxu0 %v5400_v29  ;;  %2673 = vmatprep.subr.bf16.mxu1 %v5403_v30  ;;  %v464_v29 = vcombine.high %v6694_v24, %v6694_v24  ;;  %v498_v30 = vpack.c.bf16 %v6519_v25, %v6519_v25  ;;  %v5493_v25 = vld [vmem:[%s7893_s20 + $0x62c] ss:$16 sps:$4 sm:$0xff]  }
  0x92   :  { %2428 = vmatpush1.bf16.msra.mxu0 %v5398_v32  ;;  %2674 = vmatpush1.bf16.msra.mxu1 %v5401_v33  ;;  %v5485_v32 = vld [vmem:[%s7893_s20 + $0x608] ss:$16 sps:$4 sm:$0xff]   ;;  %v5490_v33 = vld [vmem:[%s7893_s20 + $0x624] ss:$16 sps:$4 sm:$0xff]  }
  0x93   :  { %2429 = vmatprep.subr.bf16.mxu0 %v5406_v34  ;;  %2675 = vmatprep.subr.bf16.mxu1 %v5409_v35  ;;  %v501_v34 = vpack.c.bf16 %v464_v29, %v464_v29  ;;  %v5488_v35 = vld [vmem:[%s7893_s20 + $0x620] ss:$16 sps:$4 sm:$0xff]  }
  0x94   :  { %v6889_v29 = vld [vmem:[%s7894_s26 + $0x10] sm:$0xff] }
  0x96   :  { %2430 = vmatpush1.bf16.msra.mxu0 %v5404_v36  ;;  %2676 = vmatpush1.bf16.msra.mxu1 %v5407_v37  ;;  %v5491_v36 = vld [vmem:[%s7893_s20 + $0x628] ss:$16 sps:$4 sm:$0xff]   ;;  %v5496_v37 = vld [vmem:[%s7893_s20 + $0x644] ss:$16 sps:$4 sm:$0xff]  }
  0x97   :  { %2431 = vmatprep.subr.bf16.mxu0 %v5412_v38  ;;  %2677 = vmatprep.subr.bf16.mxu1 %v5415_v39  ;;  %v5499_v38 = vld [vmem:[%s7893_s20 + $0x64c] ss:$16 sps:$4 sm:$0xff]   ;;  %v5494_v39 = vld [vmem:[%s7893_s20 + $0x640] ss:$16 sps:$4 sm:$0xff]  }
  0x9a   :  { %2432 = vmatpush1.bf16.msra.mxu0 %v5410_v40  ;;  %2678 = vmatpush1.bf16.msra.mxu1 %v5413_v41  ;;  %v5497_v40 = vld [vmem:[%s7893_s20 + $0x648] ss:$16 sps:$4 sm:$0xff]   ;;  %v5502_v41 = vld [vmem:[%s7893_s20 + $0x664] ss:$16 sps:$4 sm:$0xff]  }
  0x9b   :  { %2433 = vmatprep.subr.bf16.mxu0 %v5418_v42  ;;  %2679 = vmatprep.subr.bf16.mxu1 %v5421_v44  ;;  %v5505_v42 = vld [vmem:[%s7893_s20 + $0x66c] ss:$16 sps:$4 sm:$0xff]   ;;  %v5500_v44 = vld [vmem:[%s7893_s20 + $0x660] ss:$16 sps:$4 sm:$0xff]  }
  0x9e   :  { %2434 = vmatpush1.bf16.msra.mxu0 %v5416_v45  ;;  %2680 = vmatpush1.bf16.msra.mxu1 %v5419_v46  ;;  %v5503_v45 = vld [vmem:[%s7893_s20 + $0x668] ss:$16 sps:$4 sm:$0xff]   ;;  %v5508_v46 = vld [vmem:[%s7893_s20 + $0x684] ss:$16 sps:$4 sm:$0xff]  }
  0x9f   :  { %2435 = vmatprep.subr.bf16.mxu0 %v5424_v47  ;;  %2681 = vmatprep.subr.bf16.mxu1 %v5427_v48  ;;  %v5511_v47 = vld [vmem:[%s7893_s20 + $0x68c] ss:$16 sps:$4 sm:$0xff]   ;;  %v5506_v48 = vld [vmem:[%s7893_s20 + $0x680] ss:$16 sps:$4 sm:$0xff]  }
  0xa2   :  { %2436 = vmatpush1.bf16.msra.mxu0 %v5422_v50  ;;  %2682 = vmatpush1.bf16.msra.mxu1 %v5425_v51  ;;  %v5509_v50 = vld [vmem:[%s7893_s20 + $0x688] ss:$16 sps:$4 sm:$0xff]   ;;  %v5514_v51 = vld [vmem:[%s7893_s20 + $0x6a4] ss:$16 sps:$4 sm:$0xff]  }
  0xa3   :  { %2437 = vmatprep.subr.bf16.mxu0 %v5430_v52  ;;  %2683 = vmatprep.subr.bf16.mxu1 %v5433_v53  ;;  %v5517_v52 = vld [vmem:[%s7893_s20 + $0x6ac] ss:$16 sps:$4 sm:$0xff]   ;;  %v5512_v53 = vld [vmem:[%s7893_s20 + $0x6a0] ss:$16 sps:$4 sm:$0xff]  }
  0xa6   :  { %2438 = vmatpush1.bf16.msra.mxu0 %v5428_v54  ;;  %2684 = vmatpush1.bf16.msra.mxu1 %v5431_v55  ;;  %v5515_v54 = vld [vmem:[%s7893_s20 + $0x6a8] ss:$16 sps:$4 sm:$0xff]   ;;  %v5520_v55 = vld [vmem:[%s7893_s20 + $0x6c4] ss:$16 sps:$4 sm:$0xff]  }
  0xa7   :  { %2439 = vmatprep.subr.bf16.mxu0 %v5436_v56  ;;  %2685 = vmatprep.subr.bf16.mxu1 %v5439_v57  ;;  %v5523_v56 = vld [vmem:[%s7893_s20 + $0x6cc] ss:$16 sps:$4 sm:$0xff]   ;;  %v5518_v57 = vld [vmem:[%s7893_s20 + $0x6c0] ss:$16 sps:$4 sm:$0xff]  }
  0xaa   :  { %2440 = vmatpush1.bf16.msra.mxu0 %v5434_v58  ;;  %2686 = vmatpush1.bf16.msra.mxu1 %v5437_v59  ;;  %v5521_v58 = vld [vmem:[%s7893_s20 + $0x6c8] ss:$16 sps:$4 sm:$0xff]   ;;  %v5526_v59 = vld [vmem:[%s7893_s20 + $0x6e4] ss:$16 sps:$4 sm:$0xff]  }
  0xab   :  { %2441 = vmatprep.subr.bf16.mxu0 %v5442_v60  ;;  %2687 = vmatprep.subr.bf16.mxu1 %v5445_v61  ;;  %v5529_v60 = vld [vmem:[%s7893_s20 + $0x6ec] ss:$16 sps:$4 sm:$0xff]   ;;  %v5524_v61 = vld [vmem:[%s7893_s20 + $0x6e0] ss:$16 sps:$4 sm:$0xff]  }
  0xae   :  { %2442 = vmatpush1.bf16.msra.mxu0 %v5440_v62  ;;  %2688 = vmatpush1.bf16.msra.mxu1 %v5443_v63  ;;  %v5527_v62 = vld [vmem:[%s7893_s20 + $0x6e8] ss:$16 sps:$4 sm:$0xff]   ;;  %v5532_v63 = vld [vmem:[%s7893_s20 + $0x704] ss:$16 sps:$4 sm:$0xff]  }
  0xaf   :  { %2443 = vmatprep.subr.bf16.mxu0 %v5448_v0  ;;  %2689 = vmatprep.subr.bf16.mxu1 %v5451_v1  ;;  %v5535_v0 = vld [vmem:[%s7893_s20 + $0x70c] ss:$16 sps:$4 sm:$0xff]   ;;  %v5530_v1 = vld [vmem:[%s7893_s20 + $0x700] ss:$16 sps:$4 sm:$0xff]  }
  0xb2   :  { %2444 = vmatpush1.bf16.msra.mxu0 %v5446_v2  ;;  %2690 = vmatpush1.bf16.msra.mxu1 %v5449_v3  ;;  %v5533_v2 = vld [vmem:[%s7893_s20 + $0x708] ss:$16 sps:$4 sm:$0xff]   ;;  %v5538_v3 = vld [vmem:[%s7893_s20 + $0x724] ss:$16 sps:$4 sm:$0xff]  }
  0xb3   :  { %2445 = vmatprep.subr.bf16.mxu0 %v5454_v4  ;;  %2691 = vmatprep.subr.bf16.mxu1 %v5457_v5  ;;  %v5541_v4 = vld [vmem:[%s7893_s20 + $0x72c] ss:$16 sps:$4 sm:$0xff]   ;;  %v5536_v5 = vld [vmem:[%s7893_s20 + $0x720] ss:$16 sps:$4 sm:$0xff]  }
  0xb6   :  { %2446 = vmatpush1.bf16.msra.mxu0 %v5452_v6  ;;  %2692 = vmatpush1.bf16.msra.mxu1 %v5455_v7  ;;  %v5539_v6 = vld [vmem:[%s7893_s20 + $0x728] ss:$16 sps:$4 sm:$0xff]   ;;  %v5544_v7 = vld [vmem:[%s7893_s20 + $0x744] ss:$16 sps:$4 sm:$0xff]  }
  0xb7   :  { %2447 = vmatprep.subr.bf16.mxu0 %v5460_v8  ;;  %2693 = vmatprep.subr.bf16.mxu1 %v5463_v10  ;;  %v5547_v8 = vld [vmem:[%s7893_s20 + $0x74c] ss:$16 sps:$4 sm:$0xff]   ;;  %v5542_v10 = vld [vmem:[%s7893_s20 + $0x740] ss:$16 sps:$4 sm:$0xff]  }
  0xba   :  { %2448 = vmatpush1.bf16.msra.mxu0 %v5458_v11  ;;  %2694 = vmatpush1.bf16.msra.mxu1 %v5461_v12  ;;  %v5545_v11 = vld [vmem:[%s7893_s20 + $0x748] ss:$16 sps:$4 sm:$0xff]   ;;  %v5550_v12 = vld [vmem:[%s7893_s20 + $0x764] ss:$16 sps:$4 sm:$0xff]  }
  0xbb   :  { %2449 = vmatprep.subr.bf16.mxu0 %v5466_v13  ;;  %2695 = vmatprep.subr.bf16.mxu1 %v5469_v14  ;;  %v5553_v13 = vld [vmem:[%s7893_s20 + $0x76c] ss:$16 sps:$4 sm:$0xff]   ;;  %v5548_v14 = vld [vmem:[%s7893_s20 + $0x760] ss:$16 sps:$4 sm:$0xff]  }
  0xbe   :  { %2450 = vmatpush1.bf16.msra.mxu0 %v5464_v15  ;;  %2696 = vmatpush1.bf16.msra.mxu1 %v5467_v16  ;;  %v5551_v15 = vld [vmem:[%s7893_s20 + $0x768] ss:$16 sps:$4 sm:$0xff]   ;;  %v5556_v16 = vld [vmem:[%s7893_s20 + $0x784] ss:$16 sps:$4 sm:$0xff]  }
  0xbf   :  { %2451 = vmatprep.subr.bf16.mxu0 %v5472_v17  ;;  %2697 = vmatprep.subr.bf16.mxu1 %v5475_v18  ;;  %v5559_v17 = vld [vmem:[%s7893_s20 + $0x78c] ss:$16 sps:$4 sm:$0xff]   ;;  %v5554_v18 = vld [vmem:[%s7893_s20 + $0x780] ss:$16 sps:$4 sm:$0xff]  }
  0xc2   :  { %2452 = vmatpush1.bf16.msra.mxu0 %v5470_v20  ;;  %2698 = vmatpush1.bf16.msra.mxu1 %v5473_v21  ;;  %v5562_v20 = vld [vmem:[%s7893_s20 + $0x7a4] ss:$16 sps:$4 sm:$0xff]   ;;  %v5565_v21 = vld [vmem:[%s7893_s20 + $0x7ac] ss:$16 sps:$4 sm:$0xff]  }
  0xc3   :  { %2453 = vmatprep.subr.bf16.mxu0 %v5478_v22  ;;  %2699 = vmatprep.subr.bf16.mxu1 %v5481_v23  ;;  %v5560_v22 = vld [vmem:[%s7893_s20 + $0x7a0] ss:$16 sps:$4 sm:$0xff]   ;;  %v5563_v23 = vld [vmem:[%s7893_s20 + $0x7a8] ss:$16 sps:$4 sm:$0xff]  }
  0xc6   :  { %2454 = vmatpush1.bf16.msra.mxu0 %v5476_v9  ;;  %2700 = vmatpush1.bf16.msra.mxu1 %v5479_v26  ;;  %v5568_v9 = vld [vmem:[%s7893_s20 + $0x7c4] ss:$16 sps:$4 sm:$0xff]   ;;  %v5571_v26 = vld [vmem:[%s7893_s20 + $0x7cc] ss:$16 sps:$4 sm:$0xff]  }
  0xc7   :  { %2464 = vmatprep.subr.bf16.mxu0 %v5484_v27  ;;  %2710 = vmatprep.subr.bf16.mxu1 %v5487_v28  ;;  %v5566_v27 = vld [vmem:[%s7893_s20 + $0x7c0] ss:$16 sps:$4 sm:$0xff]   ;;  %v5569_v28 = vld [vmem:[%s7893_s20 + $0x7c8] ss:$16 sps:$4 sm:$0xff]  }
  0xc9   :  { %2456 = vmatmul.mubr.bf16.vlgmr.msra.gmra.mrb[0].mxu0 %v498_v30  ;;  %2702 = vmatmul.mubr.bf16.vlgmr.msra.gmra.mrb[0].mxu1 %v498_v30  ;;  %v5574_v30 = vld [vmem:[%s7893_s20 + $0x7e4] ss:$16 sps:$4 sm:$0xff]  }
  0xca   :  { %2465 = vmatpush1.bf16.msra.mxu0 %v5482_v31  ;;  %2711 = vmatpush1.bf16.msra.mxu1 %v5485_v32  ;;  %v5577_v31 = vld [vmem:[%s7893_s20 + $0x7ec] ss:$16 sps:$4 sm:$0xff]   ;;  %v6899_v32 = vrot.slane %v6889_v29, %v6229_v49 }
  0xcb   :  { %2466 = vmatprep.subr.bf16.mxu0 %v5490_v33  ;;  %2712 = vmatprep.subr.bf16.mxu1 %v5493_v25  ;;  %v5572_v33 = vld [vmem:[%s7893_s20 + $0x7e0] ss:$16 sps:$4 sm:$0xff]   ;;  %v5575_v25 = vld [vmem:[%s7893_s20 + $0x7e8] ss:$16 sps:$4 sm:$0xff]  }
  0xcc   :  { %2496 = vmatprep.mubr.bf16.mxu0 %v501_v34  ;;  %2742 = vmatprep.mubr.bf16.mxu1 %v501_v34  ;;  %v5581_v34 = vld [vmem:[%s7893_s20 + $0x804] ss:$16 sps:$4 sm:$0xff]  }
  0xce   :  { %2467 = vmatpush1.bf16.msra.mxu0 %v5488_v35  ;;  %2713 = vmatpush1.bf16.msra.mxu1 %v5491_v36  ;;  %v5584_v35 = vld [vmem:[%s7893_s20 + $0x80c] ss:$16 sps:$4 sm:$0xff]   ;;  %v480_v36 = vcombine.high %v6899_v32, %v6899_v32 }
  0xcf   :  { %2468 = vmatprep.subr.bf16.mxu0 %v5496_v37  ;;  %2714 = vmatprep.subr.bf16.mxu1 %v5499_v38  ;;  %v5579_v37 = vld [vmem:[%s7893_s20 + $0x800] ss:$16 sps:$4 sm:$0xff]   ;;  %v5582_v38 = vld [vmem:[%s7893_s20 + $0x808] ss:$16 sps:$4 sm:$0xff]  }
  0xd2   :  { %2469 = vmatpush1.bf16.msra.mxu0 %v5494_v39  ;;  %2715 = vmatpush1.bf16.msra.mxu1 %v5497_v40  ;;  %v500_v39 = vpack.c.bf16 %v6694_v24, %v6694_v24  ;;  %v5587_v40 = vld [vmem:[%s7893_s20 + $0x824] ss:$16 sps:$4 sm:$0xff]   ;;  %v5588_v24 = vld [vmem:[%s7893_s20 + $0x828] ss:$16 sps:$4 sm:$0xff]  }
  0xd3   :  { %2470 = vmatprep.subr.bf16.mxu0 %v5502_v41  ;;  %2716 = vmatprep.subr.bf16.mxu1 %v5505_v42  ;;  %v5590_v41 = vld [vmem:[%s7893_s20 + $0x82c] ss:$16 sps:$4 sm:$0xff]   ;;  %v503_v42 = vpack.c.bf16 %v480_v36, %v480_v36  ;;  %v5663_v36 = vld [vmem:[%s7893_s20 + $0x9c0] ss:$16 sps:$4 sm:$0xff]  }
  0xd6   :  { %2471 = vmatpush1.bf16.msra.mxu0 %v5500_v44  ;;  %2717 = vmatpush1.bf16.msra.mxu1 %v5503_v45  ;;  %v5585_v44 = vld [vmem:[%s7893_s20 + $0x820] ss:$16 sps:$4 sm:$0xff]   ;;  %v5593_v45 = vld [vmem:[%s7893_s20 + $0x844] ss:$16 sps:$4 sm:$0xff]  }
  0xd7   :  { %2472 = vmatprep.subr.bf16.mxu0 %v5508_v46  ;;  %2718 = vmatprep.subr.bf16.mxu1 %v5511_v47  ;;  %v5596_v46 = vld [vmem:[%s7893_s20 + $0x84c] ss:$16 sps:$4 sm:$0xff]   ;;  %v5591_v47 = vld [vmem:[%s7893_s20 + $0x840] ss:$16 sps:$4 sm:$0xff]  }
  0xda   :  { %2473 = vmatpush1.bf16.msra.mxu0 %v5506_v48  ;;  %2719 = vmatpush1.bf16.msra.mxu1 %v5509_v50  ;;  %v5594_v48 = vld [vmem:[%s7893_s20 + $0x848] ss:$16 sps:$4 sm:$0xff]   ;;  %v5599_v50 = vld [vmem:[%s7893_s20 + $0x864] ss:$16 sps:$4 sm:$0xff]  }
  0xdb   :  { %2474 = vmatprep.subr.bf16.mxu0 %v5514_v51  ;;  %2720 = vmatprep.subr.bf16.mxu1 %v5517_v52  ;;  %v5602_v51 = vld [vmem:[%s7893_s20 + $0x86c] ss:$16 sps:$4 sm:$0xff]   ;;  %v5597_v52 = vld [vmem:[%s7893_s20 + $0x860] ss:$16 sps:$4 sm:$0xff]  }
  0xde   :  { %2475 = vmatpush1.bf16.msra.mxu0 %v5512_v53  ;;  %2721 = vmatpush1.bf16.msra.mxu1 %v5515_v54  ;;  %v5600_v53 = vld [vmem:[%s7893_s20 + $0x868] ss:$16 sps:$4 sm:$0xff]   ;;  %v5605_v54 = vld [vmem:[%s7893_s20 + $0x884] ss:$16 sps:$4 sm:$0xff]  }
  0xdf   :  { %2476 = vmatprep.subr.bf16.mxu0 %v5520_v55  ;;  %2722 = vmatprep.subr.bf16.mxu1 %v5523_v56  ;;  %v5608_v55 = vld [vmem:[%s7893_s20 + $0x88c] ss:$16 sps:$4 sm:$0xff]   ;;  %v5603_v56 = vld [vmem:[%s7893_s20 + $0x880] ss:$16 sps:$4 sm:$0xff]  }
  0xe2   :  { %2477 = vmatpush1.bf16.msra.mxu0 %v5518_v57  ;;  %2723 = vmatpush1.bf16.msra.mxu1 %v5521_v58  ;;  %v5606_v57 = vld [vmem:[%s7893_s20 + $0x888] ss:$16 sps:$4 sm:$0xff]   ;;  %v5611_v58 = vld [vmem:[%s7893_s20 + $0x8a4] ss:$16 sps:$4 sm:$0xff]  }
  0xe3   :  { %2478 = vmatprep.subr.bf16.mxu0 %v5526_v59  ;;  %2724 = vmatprep.subr.bf16.mxu1 %v5529_v60  ;;  %v5614_v59 = vld [vmem:[%s7893_s20 + $0x8ac] ss:$16 sps:$4 sm:$0xff]   ;;  %v5609_v60 = vld [vmem:[%s7893_s20 + $0x8a0] ss:$16 sps:$4 sm:$0xff]  }
  0xe6   :  { %2479 = vmatpush1.bf16.msra.mxu0 %v5524_v61  ;;  %2725 = vmatpush1.bf16.msra.mxu1 %v5527_v62  ;;  %v5612_v61 = vld [vmem:[%s7893_s20 + $0x8a8] ss:$16 sps:$4 sm:$0xff]   ;;  %v5617_v62 = vld [vmem:[%s7893_s20 + $0x8c4] ss:$16 sps:$4 sm:$0xff]  }
  0xe7   :  { %2480 = vmatprep.subr.bf16.mxu0 %v5532_v63  ;;  %2726 = vmatprep.subr.bf16.mxu1 %v5535_v0  ;;  %v5620_v63 = vld [vmem:[%s7893_s20 + $0x8cc] ss:$16 sps:$4 sm:$0xff]   ;;  %v5615_v0 = vld [vmem:[%s7893_s20 + $0x8c0] ss:$16 sps:$4 sm:$0xff]  }
  0xea   :  { %2481 = vmatpush1.bf16.msra.mxu0 %v5530_v1  ;;  %2727 = vmatpush1.bf16.msra.mxu1 %v5533_v2  ;;  %v5618_v1 = vld [vmem:[%s7893_s20 + $0x8c8] ss:$16 sps:$4 sm:$0xff]   ;;  %v5623_v2 = vld [vmem:[%s7893_s20 + $0x8e4] ss:$16 sps:$4 sm:$0xff]  }
  0xeb   :  { %2482 = vmatprep.subr.bf16.mxu0 %v5538_v3  ;;  %2728 = vmatprep.subr.bf16.mxu1 %v5541_v4  ;;  %v5626_v3 = vld [vmem:[%s7893_s20 + $0x8ec] ss:$16 sps:$4 sm:$0xff]   ;;  %v5621_v4 = vld [vmem:[%s7893_s20 + $0x8e0] ss:$16 sps:$4 sm:$0xff]  }
  0xee   :  { %2483 = vmatpush1.bf16.msra.mxu0 %v5536_v5  ;;  %2729 = vmatpush1.bf16.msra.mxu1 %v5539_v6  ;;  %v5624_v5 = vld [vmem:[%s7893_s20 + $0x8e8] ss:$16 sps:$4 sm:$0xff]   ;;  %v5629_v6 = vld [vmem:[%s7893_s20 + $0x904] ss:$16 sps:$4 sm:$0xff]  }
  0xef   :  { %2484 = vmatprep.subr.bf16.mxu0 %v5544_v7  ;;  %2730 = vmatprep.subr.bf16.mxu1 %v5547_v8  ;;  %v5632_v7 = vld [vmem:[%s7893_s20 + $0x90c] ss:$16 sps:$4 sm:$0xff]   ;;  %v5627_v8 = vld [vmem:[%s7893_s20 + $0x900] ss:$16 sps:$4 sm:$0xff]  }
  0xf2   :  { %2485 = vmatpush1.bf16.msra.mxu0 %v5542_v10  ;;  %2731 = vmatpush1.bf16.msra.mxu1 %v5545_v11  ;;  %v5630_v10 = vld [vmem:[%s7893_s20 + $0x908] ss:$16 sps:$4 sm:$0xff]   ;;  %v5635_v11 = vld [vmem:[%s7893_s20 + $0x924] ss:$16 sps:$4 sm:$0xff]  }
  0xf3   :  { %2486 = vmatprep.subr.bf16.mxu0 %v5550_v12  ;;  %2732 = vmatprep.subr.bf16.mxu1 %v5553_v13  ;;  %v5638_v12 = vld [vmem:[%s7893_s20 + $0x92c] ss:$16 sps:$4 sm:$0xff]   ;;  %v5633_v13 = vld [vmem:[%s7893_s20 + $0x920] ss:$16 sps:$4 sm:$0xff]  }
  0xf6   :  { %2487 = vmatpush1.bf16.msra.mxu0 %v5548_v14  ;;  %2733 = vmatpush1.bf16.msra.mxu1 %v5551_v15  ;;  %v5636_v14 = vld [vmem:[%s7893_s20 + $0x928] ss:$16 sps:$4 sm:$0xff]   ;;  %v5641_v15 = vld [vmem:[%s7893_s20 + $0x944] ss:$16 sps:$4 sm:$0xff]  }
  0xf7   :  { %2488 = vmatprep.subr.bf16.mxu0 %v5556_v16  ;;  %2734 = vmatprep.subr.bf16.mxu1 %v5559_v17  ;;  %v5644_v16 = vld [vmem:[%s7893_s20 + $0x94c] ss:$16 sps:$4 sm:$0xff]   ;;  %v5639_v17 = vld [vmem:[%s7893_s20 + $0x940] ss:$16 sps:$4 sm:$0xff]  }
  0xfa   :  { %2489 = vmatpush1.bf16.msra.mxu0 %v5554_v18  ;;  %2735 = vmatpush1.bf16.msra.mxu1 %v5557_v19  ;;  %v5642_v18 = vld [vmem:[%s7893_s20 + $0x948] ss:$16 sps:$4 sm:$0xff]   ;;  %v5647_v19 = vld [vmem:[%s7893_s20 + $0x964] ss:$16 sps:$4 sm:$0xff]  }
  0xfb   :  { %2490 = vmatprep.subr.bf16.mxu0 %v5562_v20  ;;  %2736 = vmatprep.subr.bf16.mxu1 %v5565_v21  ;;  %v5650_v20 = vld [vmem:[%s7893_s20 + $0x96c] ss:$16 sps:$4 sm:$0xff]   ;;  %v5645_v21 = vld [vmem:[%s7893_s20 + $0x960] ss:$16 sps:$4 sm:$0xff]  }
  0xfe   :  { %2491 = vmatpush1.bf16.msra.mxu0 %v5560_v22  ;;  %2737 = vmatpush1.bf16.msra.mxu1 %v5563_v23  ;;  %v5648_v22 = vld [vmem:[%s7893_s20 + $0x968] ss:$16 sps:$4 sm:$0xff]   ;;  %v5653_v23 = vld [vmem:[%s7893_s20 + $0x984] ss:$16 sps:$4 sm:$0xff]  }
  0xff   :  { %2492 = vmatprep.subr.bf16.mxu0 %v5568_v9  ;;  %2738 = vmatprep.subr.bf16.mxu1 %v5571_v26  ;;  %v5656_v9 = vld [vmem:[%s7893_s20 + $0x98c] ss:$16 sps:$4 sm:$0xff]   ;;  %v5651_v26 = vld [vmem:[%s7893_s20 + $0x980] ss:$16 sps:$4 sm:$0xff]  }
 0x102   :  { %2493 = vmatpush1.bf16.msra.mxu0 %v5566_v27  ;;  %2739 = vmatpush1.bf16.msra.mxu1 %v5569_v28  ;;  %v5654_v27 = vld [vmem:[%s7893_s20 + $0x988] ss:$16 sps:$4 sm:$0xff]   ;;  %v5659_v28 = vld [vmem:[%s7893_s20 + $0x9a4] ss:$16 sps:$4 sm:$0xff]  }
 0x103   :  { %2494 = vmatprep.subr.bf16.mxu0 %v5574_v30  ;;  %2740 = vmatprep.subr.bf16.mxu1 %v5577_v31  ;;  %v5662_v30 = vld [vmem:[%s7893_s20 + $0x9ac] ss:$16 sps:$4 sm:$0xff]   ;;  %v5657_v31 = vld [vmem:[%s7893_s20 + $0x9a0] ss:$16 sps:$4 sm:$0xff]  }
 0x106   :  { %2495 = vmatpush1.bf16.msra.mxu0 %v5572_v33  ;;  %2741 = vmatpush1.bf16.msra.mxu1 %v5575_v25  ;;  %v5660_v33 = vld [vmem:[%s7893_s20 + $0x9a8] ss:$16 sps:$4 sm:$0xff]   ;;  %v5665_v25 = vld [vmem:[%s7893_s20 + $0x9c4] ss:$16 sps:$4 sm:$0xff]  }
 0x107   :  { %2505 = vmatprep.subr.bf16.mxu0 %v5581_v34  ;;  %2751 = vmatprep.subr.bf16.mxu1 %v5584_v35  ;;  %v5668_v34 = vld [vmem:[%s7893_s20 + $0x9cc] ss:$16 sps:$4 sm:$0xff]   ;;  %v465_v35 = vcombine.high %v6889_v29, %v6889_v29 }
 0x108   :  { %v5674_v29 = vld [vmem:[%s7893_s20 + $0x9ec] ss:$16 sps:$4 sm:$0xff]  }
 0x109   :  { %2497 = vmatmul.mubr.bf16.vlgmr.msra.gmra.mrb[0].mxu0 %v500_v39  ;;  %2743 = vmatmul.mubr.bf16.vlgmr.msra.gmra.mrb[0].mxu1 %v500_v39  ;;  %v7100_v39 = vrot.slane %v465_v35, %v6229_v49  ;;  %v5681_v49 = vld [vmem:[%s7893_s20 + $0xa0c] ss:$16 sps:$4 sm:$0xff]  }
 0x10a   :  { %2506 = vmatpush1.bf16.msra.mxu0 %v5579_v37  ;;  %2752 = vmatpush1.bf16.msra.mxu1 %v5582_v38  ;;  %v5666_v37 = vld [vmem:[%s7893_s20 + $0x9c8] ss:$16 sps:$4 sm:$0xff]   ;;  %v5671_v38 = vld [vmem:[%s7893_s20 + $0x9e4] ss:$16 sps:$4 sm:$0xff]   ;;  %v5753_v35 = vld [vmem:[%s7895_s22 + $0x4c] ss:$16 sps:$4 sm:$0xff]  }
 0x10b   :  { %2507 = vmatprep.subr.bf16.mxu0 %v5587_v40  ;;  %2753 = vmatprep.subr.bf16.mxu1 %v5590_v41  ;;  %v5669_v40 = vld [vmem:[%s7893_s20 + $0x9e0] ss:$16 sps:$4 sm:$0xff]   ;;  %v5672_v41 = vld [vmem:[%s7893_s20 + $0x9e8] ss:$16 sps:$4 sm:$0xff]  }
 0x10c   :  { %2537 = vmatprep.mubr.bf16.mxu0 %v503_v42  ;;  %2783 = vmatprep.mubr.bf16.mxu1 %v503_v42  ;;  %v5678_v42 = vld [vmem:[%s7893_s20 + $0xa04] ss:$16 sps:$4 sm:$0xff]  }
 0x10e   :  { %2508 = vmatpush1.bf16.msra.mxu0 %v5585_v44  ;;  %2754 = vmatpush1.bf16.msra.mxu1 %v5588_v24  ;;  %v481_v44 = vcombine.high %v7100_v39, %v7100_v39  ;;  %v502_v24 = vpack.c.bf16 %v6899_v32, %v6899_v32  ;;  %v5687_v32 = vld [vmem:[%s7893_s20 + $0xa2c] ss:$16 sps:$4 sm:$0xff]  }
 0x10f   :  { %2509 = vmatprep.subr.bf16.mxu0 %v5593_v45  ;;  %2755 = vmatprep.subr.bf16.mxu1 %v5596_v46  ;;  %v5676_v45 = vld [vmem:[%s7893_s20 + $0xa00] ss:$16 sps:$4 sm:$0xff]   ;;  %v5679_v46 = vld [vmem:[%s7893_s20 + $0xa08] ss:$16 sps:$4 sm:$0xff]  }
 0x112   :  { %2510 = vmatpush1.bf16.msra.mxu0 %v5591_v47  ;;  %2756 = vmatpush1.bf16.msra.mxu1 %v5594_v48  ;;  %v5684_v47 = vld [vmem:[%s7893_s20 + $0xa24] ss:$16 sps:$4 sm:$0xff]   ;;  %v505_v48 = vpack.c.bf16 %v481_v44, %v481_v44  ;;  %v5763_v44 = vld [vmem:[%s7895_s22 + $0x88] ss:$16 sps:$4 sm:$0xff]  }
 0x113   :  { %2511 = vmatprep.subr.bf16.mxu0 %v5599_v50  ;;  %2757 = vmatprep.subr.bf16.mxu1 %v5602_v51  ;;  %v5682_v50 = vld [vmem:[%s7893_s20 + $0xa20] ss:$16 sps:$4 sm:$0xff]   ;;  %v5685_v51 = vld [vmem:[%s7893_s20 + $0xa28] ss:$16 sps:$4 sm:$0xff]  }
 0x116   :  { %2512 = vmatpush1.bf16.msra.mxu0 %v5597_v52  ;;  %2758 = vmatpush1.bf16.msra.mxu1 %v5600_v53  ;;  %v5690_v52 = vld [vmem:[%s7893_s20 + $0xa44] ss:$16 sps:$4 sm:$0xff]   ;;  %v5693_v53 = vld [vmem:[%s7893_s20 + $0xa4c] ss:$16 sps:$4 sm:$0xff]  }
 0x117   :  { %2513 = vmatprep.subr.bf16.mxu0 %v5605_v54  ;;  %2759 = vmatprep.subr.bf16.mxu1 %v5608_v55  ;;  %v5688_v54 = vld [vmem:[%s7893_s20 + $0xa40] ss:$16 sps:$4 sm:$0xff]   ;;  %v5691_v55 = vld [vmem:[%s7893_s20 + $0xa48] ss:$16 sps:$4 sm:$0xff]  }
 0x11a   :  { %2514 = vmatpush1.bf16.msra.mxu0 %v5603_v56  ;;  %2760 = vmatpush1.bf16.msra.mxu1 %v5606_v57  ;;  %v5696_v56 = vld [vmem:[%s7893_s20 + $0xa64] ss:$16 sps:$4 sm:$0xff]   ;;  %v5699_v57 = vld [vmem:[%s7893_s20 + $0xa6c] ss:$16 sps:$4 sm:$0xff]  }
 0x11b   :  { %2515 = vmatprep.subr.bf16.mxu0 %v5611_v58  ;;  %2761 = vmatprep.subr.bf16.mxu1 %v5614_v59  ;;  %v5694_v58 = vld [vmem:[%s7893_s20 + $0xa60] ss:$16 sps:$4 sm:$0xff]   ;;  %v5697_v59 = vld [vmem:[%s7893_s20 + $0xa68] ss:$16 sps:$4 sm:$0xff]  }
 0x11e   :  { %2516 = vmatpush1.bf16.msra.mxu0 %v5609_v60  ;;  %2762 = vmatpush1.bf16.msra.mxu1 %v5612_v61  ;;  %v5702_v60 = vld [vmem:[%s7893_s20 + $0xa84] ss:$16 sps:$4 sm:$0xff]   ;;  %v5705_v61 = vld [vmem:[%s7893_s20 + $0xa8c] ss:$16 sps:$4 sm:$0xff]  }
 0x11f   :  { %2517 = vmatprep.subr.bf16.mxu0 %v5617_v62  ;;  %2763 = vmatprep.subr.bf16.mxu1 %v5620_v63  ;;  %v5700_v62 = vld [vmem:[%s7893_s20 + $0xa80] ss:$16 sps:$4 sm:$0xff]   ;;  %v5703_v63 = vld [vmem:[%s7893_s20 + $0xa88] ss:$16 sps:$4 sm:$0xff]  }
 0x122   :  { %2518 = vmatpush1.bf16.msra.mxu0 %v5615_v0  ;;  %2764 = vmatpush1.bf16.msra.mxu1 %v5618_v1  ;;  %v5708_v0 = vld [vmem:[%s7893_s20 + $0xaa4] ss:$16 sps:$4 sm:$0xff]   ;;  %v5711_v1 = vld [vmem:[%s7893_s20 + $0xaac] ss:$16 sps:$4 sm:$0xff]  }
 0x123   :  { %2519 = vmatprep.subr.bf16.mxu0 %v5623_v2  ;;  %2765 = vmatprep.subr.bf16.mxu1 %v5626_v3  ;;  %v5706_v2 = vld [vmem:[%s7893_s20 + $0xaa0] ss:$16 sps:$4 sm:$0xff]   ;;  %v5709_v3 = vld [vmem:[%s7893_s20 + $0xaa8] ss:$16 sps:$4 sm:$0xff]  }
 0x126   :  { %2520 = vmatpush1.bf16.msra.mxu0 %v5621_v4  ;;  %2766 = vmatpush1.bf16.msra.mxu1 %v5624_v5  ;;  %v5714_v4 = vld [vmem:[%s7893_s20 + $0xac4] ss:$16 sps:$4 sm:$0xff]   ;;  %v5717_v5 = vld [vmem:[%s7893_s20 + $0xacc] ss:$16 sps:$4 sm:$0xff]  }
 0x127   :  { %2521 = vmatprep.subr.bf16.mxu0 %v5629_v6  ;;  %2767 = vmatprep.subr.bf16.mxu1 %v5632_v7  ;;  %v5712_v6 = vld [vmem:[%s7893_s20 + $0xac0] ss:$16 sps:$4 sm:$0xff]   ;;  %v5715_v7 = vld [vmem:[%s7893_s20 + $0xac8] ss:$16 sps:$4 sm:$0xff]  }
 0x12a   :  { %2522 = vmatpush1.bf16.msra.mxu0 %v5627_v8  ;;  %2768 = vmatpush1.bf16.msra.mxu1 %v5630_v10  ;;  %v5720_v8 = vld [vmem:[%s7893_s20 + $0xae4] ss:$16 sps:$4 sm:$0xff]   ;;  %v5723_v10 = vld [vmem:[%s7893_s20 + $0xaec] ss:$16 sps:$4 sm:$0xff]  }
 0x12b   :  { %2523 = vmatprep.subr.bf16.mxu0 %v5635_v11  ;;  %2769 = vmatprep.subr.bf16.mxu1 %v5638_v12  ;;  %v5718_v11 = vld [vmem:[%s7893_s20 + $0xae0] ss:$16 sps:$4 sm:$0xff]   ;;  %v5721_v12 = vld [vmem:[%s7893_s20 + $0xae8] ss:$16 sps:$4 sm:$0xff]  }
 0x12e   :  { %2524 = vmatpush1.bf16.msra.mxu0 %v5633_v13  ;;  %2770 = vmatpush1.bf16.msra.mxu1 %v5636_v14  ;;  %v5726_v13 = vld [vmem:[%s7893_s20 + $0xb04] ss:$16 sps:$4 sm:$0xff]   ;;  %v5729_v14 = vld [vmem:[%s7893_s20 + $0xb0c] ss:$16 sps:$4 sm:$0xff]  }
 0x12f   :  { %2525 = vmatprep.subr.bf16.mxu0 %v5641_v15  ;;  %2771 = vmatprep.subr.bf16.mxu1 %v5644_v16  ;;  %v5724_v15 = vld [vmem:[%s7893_s20 + $0xb00] ss:$16 sps:$4 sm:$0xff]   ;;  %v5727_v16 = vld [vmem:[%s7893_s20 + $0xb08] ss:$16 sps:$4 sm:$0xff]  }
 0x132   :  { %2526 = vmatpush1.bf16.msra.mxu0 %v5639_v17  ;;  %2772 = vmatpush1.bf16.msra.mxu1 %v5642_v18  ;;  %v5730_v17 = vld [vmem:[%s7893_s20 + $0xb24] ss:$16 sps:$4 sm:$0x1f]   ;;  %v5732_v18 = vld [vmem:[%s7893_s20 + $0xb2c] ss:$16 sps:$4 sm:$0x1f]  }
 0x133   :  { %2527 = vmatprep.subr.bf16.mxu0 %v5647_v19  ;;  %2773 = vmatprep.subr.bf16.mxu1 %v5650_v20  ;;  %v5734_v19 = vld [vmem:[%s7893_s20 + $0xb20] ss:$16 sps:$4 sm:$0x1f]   ;;  %v5735_v20 = vld [vmem:[%s7893_s20 + $0xb28] ss:$16 sps:$4 sm:$0x1f]  }
 0x136   :  { %2528 = vmatpush1.bf16.msra.mxu0 %v5645_v21  ;;  %2774 = vmatpush1.bf16.msra.mxu1 %v5648_v22  ;;  %v2330_v21 = vsel %vm2328_vm1, %v5734_v19, 0  ;;  %v2336_v22 = vsel %vm2328_vm1, %v5735_v20, 0  ;;  %v5820_v19 = vld [vmem:[%s7895_s22 + $0x1c0] ss:$16 sps:$4 sm:$0xff]   ;;  %v5823_v20 = vld [vmem:[%s7895_s22 + $0x1c8] ss:$16 sps:$4 sm:$0xff]  }
 0x137   :  { %2529 = vmatprep.subr.bf16.mxu0 %v5653_v23  ;;  %2775 = vmatprep.subr.bf16.mxu1 %v5656_v9  ;;  %v5738_v23 = vld [vmem:[%s7895_s22 + $0x4] ss:$16 sps:$4 sm:$0xff]   ;;  %v5741_v9 = vld [vmem:[%s7895_s22 + $0xc] ss:$16 sps:$4 sm:$0xff]  }
 0x13a   :  { %2530 = vmatpush1.bf16.msra.mxu0 %v5651_v26  ;;  %2776 = vmatpush1.bf16.msra.mxu1 %v5654_v27  ;;  %v504_v26 = vpack.c.bf16 %v7100_v39, %v7100_v39  ;;  %v5736_v27 = vld [vmem:[%s7895_s22] ss:$16 sps:$4 sm:$0xff]  }
 0x13b   :  { %2531 = vmatprep.subr.bf16.mxu0 %v5659_v28  ;;  %2777 = vmatprep.subr.bf16.mxu1 %v5662_v30  ;;  %v5739_v28 = vld [vmem:[%s7895_s22 + $0x8] ss:$16 sps:$4 sm:$0xff]   ;;  %v5744_v30 = vld [vmem:[%s7895_s22 + $0x24] ss:$16 sps:$4 sm:$0xff]   ;;  %v5754_v39 = vld [vmem:[%s7895_s22 + $0x60] ss:$16 sps:$4 sm:$0xff]  }
 0x13e   :  { %2532 = vmatpush1.bf16.msra.mxu0 %v5657_v31  ;;  %2778 = vmatpush1.bf16.msra.mxu1 %v5660_v33  ;;  %v5747_v31 = vld [vmem:[%s7895_s22 + $0x2c] ss:$16 sps:$4 sm:$0xff]   ;;  %v5742_v33 = vld [vmem:[%s7895_s22 + $0x20] ss:$16 sps:$4 sm:$0xff]  }
 0x13f   :  { %2533 = vmatprep.subr.bf16.mxu0 %v5665_v25  ;;  %2779 = vmatprep.subr.bf16.mxu1 %v5668_v34  ;;  %v5745_v25 = vld [vmem:[%s7895_s22 + $0x28] ss:$16 sps:$4 sm:$0xff]   ;;  %v5750_v34 = vld [vmem:[%s7895_s22 + $0x44] ss:$16 sps:$4 sm:$0xff]  }
 0x142   :  { %2534 = vmatpush1.bf16.msra.mxu0 %v5663_v36  ;;  %2780 = vmatpush1.bf16.msra.mxu1 %v5666_v37  ;;  %v5748_v36 = vld [vmem:[%s7895_s22 + $0x40] ss:$16 sps:$4 sm:$0xff]   ;;  %v5751_v37 = vld [vmem:[%s7895_s22 + $0x48] ss:$16 sps:$4 sm:$0xff]  }
 0x143   :  { %2535 = vmatprep.subr.bf16.mxu0 %v5671_v38  ;;  %2781 = vmatprep.subr.bf16.mxu1 %v5674_v29  ;;  %v5756_v38 = vld [vmem:[%s7895_s22 + $0x64] ss:$16 sps:$4 sm:$0xff]   ;;  %v5759_v29 = vld [vmem:[%s7895_s22 + $0x6c] ss:$16 sps:$4 sm:$0xff]  }
 0x146   :  { %2536 = vmatpush1.bf16.msra.mxu0 %v5669_v40  ;;  %2782 = vmatpush1.bf16.msra.mxu1 %v5672_v41  ;;  %v5757_v40 = vld [vmem:[%s7895_s22 + $0x68] ss:$16 sps:$4 sm:$0xff]   ;;  %v5762_v41 = vld [vmem:[%s7895_s22 + $0x84] ss:$16 sps:$4 sm:$0xff]  }
 0x147   :  { %2546 = vmatprep.subr.bf16.mxu0 %v5678_v42  ;;  %2792 = vmatprep.subr.bf16.mxu1 %v5681_v49  ;;  %v5765_v42 = vld [vmem:[%s7895_s22 + $0x8c] ss:$16 sps:$4 sm:$0xff]   ;;  %v5760_v49 = vld [vmem:[%s7895_s22 + $0x80] ss:$16 sps:$4 sm:$0xff]  }
 0x149   :  { %2538 = vmatmul.mubr.bf16.vlgmr.msra.gmra.mrb[0].mxu0 %v502_v24  ;;  %2784 = vmatmul.mubr.bf16.vlgmr.msra.gmra.mrb[0].mxu1 %v502_v24  ;;  %v5768_v24 = vld [vmem:[%s7895_s22 + $0xa4] ss:$16 sps:$4 sm:$0xff]  }
 0x14a   :  { %2547 = vmatpush1.bf16.msra.mxu0 %v5676_v45  ;;  %2793 = vmatpush1.bf16.msra.mxu1 %v5679_v46  ;;  %v5771_v45 = vld [vmem:[%s7895_s22 + $0xac] ss:$16 sps:$4 sm:$0xff]   ;;  %v5766_v46 = vld [vmem:[%s7895_s22 + $0xa0] ss:$16 sps:$4 sm:$0xff]  }
 0x14b   :  { %2548 = vmatprep.subr.bf16.mxu0 %v5684_v47  ;;  %2794 = vmatprep.subr.bf16.mxu1 %v5687_v32  ;;  %v5769_v47 = vld [vmem:[%s7895_s22 + $0xa8] ss:$16 sps:$4 sm:$0xff]   ;;  %v5774_v32 = vld [vmem:[%s7895_s22 + $0xc4] ss:$16 sps:$4 sm:$0xff]  }
 0x14c   :  { %4883 = vmatprep.mubr.msk.bf16.mxu0 %vm2324_vm0, %v505_v48  ;;  %4885 = vmatprep.mubr.msk.bf16.mxu1 %vm2324_vm0, %v505_v48  ;;  %v5777_v48 = vld [vmem:[%s7895_s22 + $0xcc] ss:$16 sps:$4 sm:$0xff]   ;;  %vm5993_vm0 = vmmov 0  }
 0x14e   :  { %2549 = vmatpush1.bf16.msra.mxu0 %v5682_v50  ;;  %2795 = vmatpush1.bf16.msra.mxu1 %v5685_v51  ;;  %v5772_v50 = vld [vmem:[%s7895_s22 + $0xc0] ss:$16 sps:$4 sm:$0xff]   ;;  %v5775_v51 = vld [vmem:[%s7895_s22 + $0xc8] ss:$16 sps:$4 sm:$0xff]  }
 0x14f   :  { %2550 = vmatprep.subr.bf16.mxu0 %v5690_v52  ;;  %2796 = vmatprep.subr.bf16.mxu1 %v5693_v53  ;;  %v5780_v52 = vld [vmem:[%s7895_s22 + $0xe4] ss:$16 sps:$4 sm:$0xff]   ;;  %v5783_v53 = vld [vmem:[%s7895_s22 + $0xec] ss:$16 sps:$4 sm:$0xff]  }
 0x152   :  { %2551 = vmatpush1.bf16.msra.mxu0 %v5688_v54  ;;  %2797 = vmatpush1.bf16.msra.mxu1 %v5691_v55  ;;  %v5778_v54 = vld [vmem:[%s7895_s22 + $0xe0] ss:$16 sps:$4 sm:$0xff]   ;;  %v5781_v55 = vld [vmem:[%s7895_s22 + $0xe8] ss:$16 sps:$4 sm:$0xff]  }
 0x153   :  { %2552 = vmatprep.subr.bf16.mxu0 %v5696_v56  ;;  %2798 = vmatprep.subr.bf16.mxu1 %v5699_v57  ;;  %v5786_v56 = vld [vmem:[%s7895_s22 + $0x104] ss:$16 sps:$4 sm:$0xff]   ;;  %v5789_v57 = vld [vmem:[%s7895_s22 + $0x10c] ss:$16 sps:$4 sm:$0xff]  }
 0x156   :  { %2553 = vmatpush1.bf16.msra.mxu0 %v5694_v58  ;;  %2799 = vmatpush1.bf16.msra.mxu1 %v5697_v59  ;;  %v5784_v58 = vld [vmem:[%s7895_s22 + $0x100] ss:$16 sps:$4 sm:$0xff]   ;;  %v5787_v59 = vld [vmem:[%s7895_s22 + $0x108] ss:$16 sps:$4 sm:$0xff]  }
 0x157   :  { %2554 = vmatprep.subr.bf16.mxu0 %v5702_v60  ;;  %2800 = vmatprep.subr.bf16.mxu1 %v5705_v61  ;;  %v5792_v60 = vld [vmem:[%s7895_s22 + $0x124] ss:$16 sps:$4 sm:$0xff]   ;;  %v5795_v61 = vld [vmem:[%s7895_s22 + $0x12c] ss:$16 sps:$4 sm:$0xff]  }
 0x15a   :  { %2555 = vmatpush1.bf16.msra.mxu0 %v5700_v62  ;;  %2801 = vmatpush1.bf16.msra.mxu1 %v5703_v63  ;;  %v5790_v62 = vld [vmem:[%s7895_s22 + $0x120] ss:$16 sps:$4 sm:$0xff]   ;;  %v5793_v63 = vld [vmem:[%s7895_s22 + $0x128] ss:$16 sps:$4 sm:$0xff]  }
 0x15b   :  { %2556 = vmatprep.subr.bf16.mxu0 %v5708_v0  ;;  %2802 = vmatprep.subr.bf16.mxu1 %v5711_v1  ;;  %v5798_v0 = vld [vmem:[%s7895_s22 + $0x144] ss:$16 sps:$4 sm:$0xff]   ;;  %v5801_v1 = vld [vmem:[%s7895_s22 + $0x14c] ss:$16 sps:$4 sm:$0xff]  }
 0x15e   :  { %2557 = vmatpush1.bf16.msra.mxu0 %v5706_v2  ;;  %2803 = vmatpush1.bf16.msra.mxu1 %v5709_v3  ;;  %v5796_v2 = vld [vmem:[%s7895_s22 + $0x140] ss:$16 sps:$4 sm:$0xff]   ;;  %v5799_v3 = vld [vmem:[%s7895_s22 + $0x148] ss:$16 sps:$4 sm:$0xff]  }
 0x15f   :  { %2558 = vmatprep.subr.bf16.mxu0 %v5714_v4  ;;  %2804 = vmatprep.subr.bf16.mxu1 %v5717_v5  ;;  %v5804_v4 = vld [vmem:[%s7895_s22 + $0x164] ss:$16 sps:$4 sm:$0xff]   ;;  %v5807_v5 = vld [vmem:[%s7895_s22 + $0x16c] ss:$16 sps:$4 sm:$0xff]  }
 0x162   :  { %2559 = vmatpush1.bf16.msra.mxu0 %v5712_v6  ;;  %2805 = vmatpush1.bf16.msra.mxu1 %v5715_v7  ;;  %v5802_v6 = vld [vmem:[%s7895_s22 + $0x160] ss:$16 sps:$4 sm:$0xff]   ;;  %v5805_v7 = vld [vmem:[%s7895_s22 + $0x168] ss:$16 sps:$4 sm:$0xff]  }
 0x163   :  { %2560 = vmatprep.subr.bf16.mxu0 %v5720_v8  ;;  %2806 = vmatprep.subr.bf16.mxu1 %v5723_v10  ;;  %v5810_v8 = vld [vmem:[%s7895_s22 + $0x184] ss:$16 sps:$4 sm:$0xff]   ;;  %v5813_v10 = vld [vmem:[%s7895_s22 + $0x18c] ss:$16 sps:$4 sm:$0xff]  }
 0x166   :  { %2561 = vmatpush1.bf16.msra.mxu0 %v5718_v11  ;;  %2807 = vmatpush1.bf16.msra.mxu1 %v5721_v12  ;;  %v5808_v11 = vld [vmem:[%s7895_s22 + $0x180] ss:$16 sps:$4 sm:$0xff]   ;;  %v5811_v12 = vld [vmem:[%s7895_s22 + $0x188] ss:$16 sps:$4 sm:$0xff]  }
 0x167   :  { %2562 = vmatprep.subr.bf16.mxu0 %v5726_v13  ;;  %2808 = vmatprep.subr.bf16.mxu1 %v5729_v14  ;;  %v5816_v13 = vld [vmem:[%s7895_s22 + $0x1a4] ss:$16 sps:$4 sm:$0xff]   ;;  %v5819_v14 = vld [vmem:[%s7895_s22 + $0x1ac] ss:$16 sps:$4 sm:$0xff]  }
 0x16a   :  { %2563 = vmatpush1.bf16.msra.mxu0 %v5724_v15  ;;  %2809 = vmatpush1.bf16.msra.mxu1 %v5727_v16  ;;  %v5814_v15 = vld [vmem:[%s7895_s22 + $0x1a0] ss:$16 sps:$4 sm:$0xff]   ;;  %v5817_v16 = vld [vmem:[%s7895_s22 + $0x1a8] ss:$16 sps:$4 sm:$0xff]  }
 0x16b   :  { %4882 = vmatprep.subr.msk.bf16.mxu0 %vm2328_vm1, %v5730_v17  ;;  %4884 = vmatprep.subr.msk.bf16.mxu1 %vm2328_vm1, %v5732_v18  ;;  %v5822_v17 = vld [vmem:[%s7895_s22 + $0x1c4] ss:$16 sps:$4 sm:$0xff]   ;;  %v5825_v18 = vld [vmem:[%s7895_s22 + $0x1cc] ss:$16 sps:$4 sm:$0xff]  }
 0x16e   :  { %2565 = vmatpush1.bf16.msra.mxu0 %v2330_v21  ;;  %2811 = vmatpush1.bf16.msra.mxu1 %v2336_v22  ;;  %v5828_v21 = vld [vmem:[%s7895_s22 + $0x1e4] ss:$16 sps:$4 sm:$0xff]   ;;  %v5831_v22 = vld [vmem:[%s7895_s22 + $0x1ec] ss:$16 sps:$4 sm:$0xff]  }
 0x16f   :  { %3475 = vmatprep.subr.bf16.mxu0 %v5738_v23  ;;  %3557 = vmatprep.subr.bf16.mxu1 %v5741_v9  ;;  %v5826_v23 = vld [vmem:[%s7895_s22 + $0x1e0] ss:$16 sps:$4 sm:$0xff]   ;;  %v5829_v9 = vld [vmem:[%s7895_s22 + $0x1e8] ss:$16 sps:$4 sm:$0xff]  }
 0x171   :  { %2579 = vmatmul.mubr.bf16.vlgmr.msra.gmra.mrb[0].mxu0 %v504_v26  ;;  %2825 = vmatmul.mubr.bf16.vlgmr.msra.gmra.mrb[0].mxu1 %v504_v26  ;;  %v5834_v26 = vld [vmem:[%s7895_s22 + $0x204] ss:$16 sps:$4 sm:$0xff]  }
 0x172   :  { %3476 = vmatpush1.bf16.msra.mxu0 %v5736_v27  ;;  %3558 = vmatpush1.bf16.msra.mxu1 %v5739_v28  ;;  %v5837_v27 = vld [vmem:[%s7895_s22 + $0x20c] ss:$16 sps:$4 sm:$0xff]   ;;  %v7437_v28 = vsub.s32 0, %v6211_v43 }
 0x173   :  { %3477 = vmatprep.subr.bf16.mxu0 %v5744_v30  ;;  %3559 = vmatprep.subr.bf16.mxu1 %v5747_v31  ;;  %v7442_v30 = vld [vmem:[%s7869_s3] sm:$0xf]  ;;  %v7445_v31 = vsub.s32 1, %v6211_v43 }
 0x176   :  { %3478 = vmatpush1.bf16.msra.mxu0 %v5742_v33  ;;  %3560 = vmatpush1.bf16.msra.mxu1 %v5745_v25  ;;  %v522_v33 = vsub.s32 3, %v6211_v43  ;;  %v511_v25 = vrot.slane %v7442_v30, %v7437_v28 }
 0x177   :  { %3479 = vmatprep.subr.bf16.mxu0 %v5750_v34  ;;  %3561 = vmatprep.subr.bf16.mxu1 %v5753_v35  ;;  %v515_v34 = vrot.slane %v7442_v30, %v7445_v31 }
 0x178   :  { %v523_v35 = vrot.slane %v7442_v30, %v522_v33 }
 0x17a   :  { %3480 = vmatpush1.bf16.msra.mxu0 %v5748_v36  ;;  %3562 = vmatpush1.bf16.msra.mxu1 %v5751_v37 }
 0x17b   :  { %3481 = vmatprep.subr.bf16.mxu0 %v5756_v38  ;;  %3563 = vmatprep.subr.bf16.mxu1 %v5759_v29 }
 0x17e   :  { %3482 = vmatpush1.bf16.msra.mxu0 %v5754_v39  ;;  %3564 = vmatpush1.bf16.msra.mxu1 %v5757_v40 }
 0x17f   :  { %3483 = vmatprep.subr.bf16.mxu0 %v5762_v41  ;;  %3565 = vmatprep.subr.bf16.mxu1 %v5765_v42 }
 0x182   :  { %3484 = vmatpush1.bf16.msra.mxu0 %v5760_v49  ;;  %3566 = vmatpush1.bf16.msra.mxu1 %v5763_v44 }
 0x183   :  { %3485 = vmatprep.subr.bf16.mxu0 %v5768_v24  ;;  %3567 = vmatprep.subr.bf16.mxu1 %v5771_v45 }
 0x186   :  { %3486 = vmatpush1.bf16.msra.mxu0 %v5766_v46  ;;  %3568 = vmatpush1.bf16.msra.mxu1 %v5769_v47 }
 0x187   :  { %3487 = vmatprep.subr.bf16.mxu0 %v5774_v32  ;;  %3569 = vmatprep.subr.bf16.mxu1 %v5777_v48 }
 0x18a   :  { %3488 = vmatpush1.bf16.msra.mxu0 %v5772_v50  ;;  %3570 = vmatpush1.bf16.msra.mxu1 %v5775_v51 }
 0x18b   :  { %3489 = vmatprep.subr.bf16.mxu0 %v5780_v52  ;;  %3571 = vmatprep.subr.bf16.mxu1 %v5783_v53  ;;  %v5832_v52 = vld [vmem:[%s7895_s22 + $0x200] ss:$16 sps:$4 sm:$0xff]   ;;  %v5835_v53 = vld [vmem:[%s7895_s22 + $0x208] ss:$16 sps:$4 sm:$0xff]  }
 0x18e   :  { %3490 = vmatpush1.bf16.msra.mxu0 %v5778_v54  ;;  %3572 = vmatpush1.bf16.msra.mxu1 %v5781_v55  ;;  %v5840_v55 = vld [vmem:[%s7895_s22 + $0x224] ss:$16 sps:$4 sm:$0xff]  }
 0x18f   :  { %3491 = vmatprep.subr.bf16.mxu0 %v5786_v56  ;;  %3573 = vmatprep.subr.bf16.mxu1 %v5789_v57  ;;  %v5843_v56 = vld [vmem:[%s7895_s22 + $0x22c] ss:$16 sps:$4 sm:$0xff]  }
 0x192   :  { %3492 = vmatpush1.bf16.msra.mxu0 %v5784_v58  ;;  %3574 = vmatpush1.bf16.msra.mxu1 %v5787_v59  ;;  %v5838_v58 = vld [vmem:[%s7895_s22 + $0x220] ss:$16 sps:$4 sm:$0xff]   ;;  %v5841_v59 = vld [vmem:[%s7895_s22 + $0x228] ss:$16 sps:$4 sm:$0xff]  }
 0x193   :  { %3493 = vmatprep.subr.bf16.mxu0 %v5792_v60  ;;  %3575 = vmatprep.subr.bf16.mxu1 %v5795_v61  ;;  %v5846_v60 = vld [vmem:[%s7895_s22 + $0x244] ss:$16 sps:$4 sm:$0xff]   ;;  %v5849_v61 = vld [vmem:[%s7895_s22 + $0x24c] ss:$16 sps:$4 sm:$0xff]  }
 0x196   :  { %3494 = vmatpush1.bf16.msra.mxu0 %v5790_v62  ;;  %3576 = vmatpush1.bf16.msra.mxu1 %v5793_v63  ;;  %v5844_v62 = vld [vmem:[%s7895_s22 + $0x240] ss:$16 sps:$4 sm:$0xff]   ;;  %v5847_v63 = vld [vmem:[%s7895_s22 + $0x248] ss:$16 sps:$4 sm:$0xff]  }
 0x197   :  { %3495 = vmatprep.subr.bf16.mxu0 %v5798_v0  ;;  %3577 = vmatprep.subr.bf16.mxu1 %v5801_v1  ;;  %v5852_v0 = vld [vmem:[%s7895_s22 + $0x264] ss:$16 sps:$4 sm:$0xff]   ;;  %v5855_v1 = vld [vmem:[%s7895_s22 + $0x26c] ss:$16 sps:$4 sm:$0xff]  }
 0x19a   :  { %3496 = vmatpush1.bf16.msra.mxu0 %v5796_v2  ;;  %3578 = vmatpush1.bf16.msra.mxu1 %v5799_v3  ;;  %v5850_v2 = vld [vmem:[%s7895_s22 + $0x260] ss:$16 sps:$4 sm:$0xff]   ;;  %v5853_v3 = vld [vmem:[%s7895_s22 + $0x268] ss:$16 sps:$4 sm:$0xff]  }
 0x19b   :  { %3497 = vmatprep.subr.bf16.mxu0 %v5804_v4  ;;  %3579 = vmatprep.subr.bf16.mxu1 %v5807_v5  ;;  %v5858_v4 = vld [vmem:[%s7895_s22 + $0x284] ss:$16 sps:$4 sm:$0xff]   ;;  %v5861_v5 = vld [vmem:[%s7895_s22 + $0x28c] ss:$16 sps:$4 sm:$0xff]  }
 0x19e   :  { %3498 = vmatpush1.bf16.msra.mxu0 %v5802_v6  ;;  %3580 = vmatpush1.bf16.msra.mxu1 %v5805_v7  ;;  %v5856_v6 = vld [vmem:[%s7895_s22 + $0x280] ss:$16 sps:$4 sm:$0xff]   ;;  %v5859_v7 = vld [vmem:[%s7895_s22 + $0x288] ss:$16 sps:$4 sm:$0xff]  }
 0x19f   :  { %3499 = vmatprep.subr.bf16.mxu0 %v5810_v8  ;;  %3581 = vmatprep.subr.bf16.mxu1 %v5813_v10  ;;  %v5864_v8 = vld [vmem:[%s7895_s22 + $0x2a4] ss:$16 sps:$4 sm:$0xff]   ;;  %v5867_v10 = vld [vmem:[%s7895_s22 + $0x2ac] ss:$16 sps:$4 sm:$0xff]  }
 0x1a2   :  { %3500 = vmatpush1.bf16.msra.mxu0 %v5808_v11  ;;  %3582 = vmatpush1.bf16.msra.mxu1 %v5811_v12  ;;  %v518_v11 = vsub.s32 2, %v6211_v43  ;;  %v5862_v12 = vld [vmem:[%s7895_s22 + $0x2a0] ss:$16 sps:$4 sm:$0xff]   ;;  %v5960_v43 = vld [vmem:[%s7896_s23 + $0x184] ss:$8 sps:$4 sm:$0xff]  }
 0x1a3   :  { %3501 = vmatprep.subr.bf16.mxu0 %v5816_v13  ;;  %3583 = vmatprep.subr.bf16.mxu1 %v5819_v14  ;;  %v5865_v13 = vld [vmem:[%s7895_s22 + $0x2a8] ss:$16 sps:$4 sm:$0xff]   ;;  %v5870_v14 = vld [vmem:[%s7895_s22 + $0x2c4] ss:$16 sps:$4 sm:$0xff]  }
 0x1a6   :  { %3502 = vmatpush1.bf16.msra.mxu0 %v5814_v15  ;;  %3584 = vmatpush1.bf16.msra.mxu1 %v5817_v16  ;;  %v5873_v15 = vld [vmem:[%s7895_s22 + $0x2cc] ss:$16 sps:$4 sm:$0xff]   ;;  %v519_v16 = vrot.slane %v7442_v30, %v518_v11  ;;  %v5880_v30 = vld [vmem:[%s7895_s22 + $0x300] ss:$16 sps:$4 sm:$0xff]  }
 0x1a7   :  { %3503 = vmatprep.subr.bf16.mxu0 %v5822_v17  ;;  %3585 = vmatprep.subr.bf16.mxu1 %v5825_v18  ;;  %v5868_v17 = vld [vmem:[%s7895_s22 + $0x2c0] ss:$16 sps:$4 sm:$0xff]   ;;  %v5871_v18 = vld [vmem:[%s7895_s22 + $0x2c8] ss:$16 sps:$4 sm:$0xff]  }
 0x1aa   :  { %3504 = vmatpush1.bf16.msra.mxu0 %v5820_v19  ;;  %3586 = vmatpush1.bf16.msra.mxu1 %v5823_v20  ;;  %v5876_v19 = vld [vmem:[%s7895_s22 + $0x2e4] ss:$16 sps:$4 sm:$0xff]   ;;  %v5879_v20 = vld [vmem:[%s7895_s22 + $0x2ec] ss:$16 sps:$4 sm:$0xff]  }
 0x1ab   :  { %3505 = vmatprep.subr.bf16.mxu0 %v5828_v21  ;;  %3587 = vmatprep.subr.bf16.mxu1 %v5831_v22  ;;  %v5874_v22 = vld [vmem:[%s7895_s22 + $0x2e0] ss:$16 sps:$4 sm:$0xff]  }
 0x1ae   :  { %3506 = vmatpush1.bf16.msra.mxu0 %v5826_v23  ;;  %3588 = vmatpush1.bf16.msra.mxu1 %v5829_v9  ;;  %v5877_v23 = vld [vmem:[%s7895_s22 + $0x2e8] ss:$16 sps:$4 sm:$0xff]   ;;  %v5882_v9 = vld [vmem:[%s7895_s22 + $0x304] ss:$16 sps:$4 sm:$0xff]  }
 0x1af   :  { %3516 = vmatprep.subr.bf16.mxu0 %v5834_v26  ;;  %3598 = vmatprep.subr.bf16.mxu1 %v5837_v27  ;;  %v5885_v26 = vld [vmem:[%s7895_s22 + $0x30c] ss:$16 sps:$4 sm:$0xff]  }
 0x244   :  { %v2580_v36 = vpop.f32.mrb[0].mxu0  ;;  %v7455_v37 = vpop.f32.mrb[0].mxu1 }
 0x245   :  { %v5127_v38 = vadd.f32 %v2580_v36, %v511_v25  ;;  %v2582_v29 = vpop.f32.mrb[1].mxu0  ;;  %v2828_v39 = vpop.f32.mrb[1].mxu1  ;;  %v5129_v21 = vadd.f32 %v7455_v37, %v519_v16  ;;  %v5883_v25 = vld [vmem:[%s7895_s22 + $0x308] ss:$16 sps:$4 sm:$0xff]   ;;  %v5971_v16 = vld [vmem:[%s7870_s8 + $0x50] sm:$0xff]  }
 0x246   :  { %v5128_v40 = vadd.f32 %v2582_v29, %v515_v34  ;;  %v5130_v41 = vadd.f32 %v2828_v39, %v523_v35  ;;  %v2584_v42 = vpop.f32.mrb[2].mxu0  ;;  %v2830_v49 = vpop.f32.mrb[2].mxu1  ;;  %v5888_v34 = vld [vmem:[%s7896_s23 + $0x4] ss:$8 sps:$4 sm:$0xff]   ;;  %v5886_v36 = vld [vmem:[%s7896_s23] ss:$8 sps:$4 sm:$0xff]  }
 0x247   :  { %vm2833_vm2 = vcmp.gt.f32.partialorder %v5127_v38, 0.0  ;;  %v2837_v44 = vmul.f32 0.01, %v5127_v38  ;;  %v2585_v47 = vpop.f32.mrb[3].mxu0  ;;  %v2831_v32 = vpop.f32.mrb[3].mxu1  ;;  %vm2835_vm6 = vcmp.gt.f32.partialorder %v5129_v21, 0.0 }
 0x248   :  { %vm2834_vm3 = vcmp.gt.f32.partialorder %v5128_v40, 0.0  ;;  %v2838_v24 = vmul.f32 0.01, %v5128_v40  ;;  %vm2836_vm4 = vcmp.gt.f32.partialorder %v5130_v41, 0.0  ;;  %v2840_v45 = vmul.f32 0.01, %v5130_v41 }
 0x249   :  { %v2841_v46 = vsel %vm2833_vm2, %v5127_v38, %v2837_v44  ;;  %v2839_v27 = vmul.f32 0.01, %v5129_v21  ;;  %v5891_v38 = vld [vmem:[%s7896_s23 + $0x14] ss:$8 sps:$4 sm:$0xff]   ;;  %v5889_v29 = vld [vmem:[%s7896_s23 + $0x10] ss:$8 sps:$4 sm:$0xff]  }
 0x24a   :  { %v2842_v48 = vsel %vm2834_vm3, %v5128_v40, %v2838_v24  ;;  %v2844_v50 = vsel %vm2836_vm4, %v5130_v41, %v2840_v45  ;;  %v2945_v54 = vpack.c.bf16 %v2841_v46, %v2841_v46  ;;  %v5894_v39 = vld [vmem:[%s7896_s23 + $0x24] ss:$8 sps:$4 sm:$0xff]   ;;  %v5892_v40 = vld [vmem:[%s7896_s23 + $0x20] ss:$8 sps:$4 sm:$0xff]   ;;  %v5897_v41 = vld [vmem:[%s7896_s23 + $0x34] ss:$8 sps:$4 sm:$0xff]  }
 0x24b   :  { %v2946_v51 = vpack.c.bf16 %v2842_v48, %v2842_v48  ;;  %v2948_v57 = vpack.c.bf16 %v2844_v50, %v2844_v50  ;;  %v2843_v35 = vsel %vm2835_vm6, %v5129_v21, %v2839_v27  ;;  %v5895_v42 = vld [vmem:[%s7896_s23 + $0x30] ss:$8 sps:$4 sm:$0xff]   ;;  %v5900_v49 = vld [vmem:[%s7896_s23 + $0x44] ss:$8 sps:$4 sm:$0xff]   ;;  %v5898_v44 = vld [vmem:[%s7896_s23 + $0x40] ss:$8 sps:$4 sm:$0xff]  }
 0x24c   :  { %v2947_v37 = vpack.c.bf16 %v2843_v35, %v2843_v35  ;;  %v5903_v24 = vld [vmem:[%s7896_s23 + $0x54] ss:$8 sps:$4 sm:$0xff]   ;;  %v5901_v45 = vld [vmem:[%s7896_s23 + $0x50] ss:$8 sps:$4 sm:$0xff]   ;;  %v5906_v46 = vld [vmem:[%s7896_s23 + $0x64] ss:$8 sps:$4 sm:$0xff]  }
 0x24d   :  { %3507 = vmatprep.mubr.bf16.mxu0 %v2946_v51  ;;  %3589 = vmatprep.mubr.bf16.mxu1 %v2946_v51  ;;  %v5904_v47 = vld [vmem:[%s7896_s23 + $0x60] ss:$8 sps:$4 sm:$0xff]   ;;  %v5909_v32 = vld [vmem:[%s7896_s23 + $0x74] ss:$8 sps:$4 sm:$0xff]   ;;  %v5907_v48 = vld [vmem:[%s7896_s23 + $0x70] ss:$8 sps:$4 sm:$0xff]  }
 0x24e   :  { %3508 = vmatmul.mubr.bf16.vlgmr.msra.gmra.mrb[4].mxu0 %v2945_v54  ;;  %3590 = vmatmul.mubr.bf16.vlgmr.msra.gmra.mrb[4].mxu1 %v2945_v54  ;;  %v5912_v50 = vld [vmem:[%s7896_s23 + $0x84] ss:$8 sps:$4 sm:$0xff]   ;;  %v5910_v51 = vld [vmem:[%s7896_s23 + $0x80] ss:$8 sps:$4 sm:$0xff]   ;;  %vm4278_vm3 = vcmask 818176   ;;  %vm4369_vm4 = vcmask 1040384  }
 0x24f   :  { %3517 = vmatpush1.bf16.msra.mxu0 %v5832_v52  ;;  %3599 = vmatpush1.bf16.msra.mxu1 %v5835_v53  ;;  %v5915_v52 = vld [vmem:[%s7896_s23 + $0x94] ss:$8 sps:$4 sm:$0xff]   ;;  %v5913_v53 = vld [vmem:[%s7896_s23 + $0x90] ss:$8 sps:$4 sm:$0xff]   ;;  %v5918_v54 = vld [vmem:[%s7896_s23 + $0xa4] ss:$8 sps:$4 sm:$0xff]  }
 0x250   :  { %4986 = vmatprep.mubr.msk.bf16.mxu0 %vm3471_vm5, %v2948_v57  ;;  %4987 = vmatprep.mubr.msk.bf16.mxu1 %vm3471_vm5, %v2948_v57  ;;  %v5919_v57 = vld [vmem:[%s7896_s23 + $0xb0] ss:$8 sps:$4 sm:$0xff]   ;;  %vm4365_vm6 = vcmask 408576  }
 0x251   :  { %3518 = vmatprep.subr.bf16.mxu0 %v5840_v55  ;;  %3600 = vmatprep.subr.bf16.mxu1 %v5843_v56  ;;  %v5916_v55 = vld [vmem:[%s7896_s23 + $0xa0] ss:$8 sps:$4 sm:$0xff]   ;;  %v5921_v56 = vld [vmem:[%s7896_s23 + $0xb4] ss:$8 sps:$4 sm:$0xff]  }
 0x253   :  { %3519 = vmatpush1.bf16.msra.mxu0 %v5838_v58  ;;  %3601 = vmatpush1.bf16.msra.mxu1 %v5841_v59  ;;  %v5924_v58 = vld [vmem:[%s7896_s23 + $0xc4] ss:$8 sps:$4 sm:$0xff]   ;;  %v5922_v59 = vld [vmem:[%s7896_s23 + $0xc0] ss:$8 sps:$4 sm:$0xff]  }
 0x254   :  { %3520 = vmatprep.subr.bf16.mxu0 %v5846_v60  ;;  %3602 = vmatprep.subr.bf16.mxu1 %v5849_v61  ;;  %v5927_v60 = vld [vmem:[%s7896_s23 + $0xd4] ss:$8 sps:$4 sm:$0xff]   ;;  %v5925_v61 = vld [vmem:[%s7896_s23 + $0xd0] ss:$8 sps:$4 sm:$0xff]  }
 0x257   :  { %3521 = vmatpush1.bf16.msra.mxu0 %v5844_v62  ;;  %3603 = vmatpush1.bf16.msra.mxu1 %v5847_v63  ;;  %v5930_v62 = vld [vmem:[%s7896_s23 + $0xe4] ss:$8 sps:$4 sm:$0xff]   ;;  %v5928_v63 = vld [vmem:[%s7896_s23 + $0xe0] ss:$8 sps:$4 sm:$0xff]  }
 0x258   :  { %3522 = vmatprep.subr.bf16.mxu0 %v5852_v0  ;;  %3604 = vmatprep.subr.bf16.mxu1 %v5855_v1  ;;  %v5933_v0 = vld [vmem:[%s7896_s23 + $0xf4] ss:$8 sps:$4 sm:$0xff]   ;;  %v5931_v1 = vld [vmem:[%s7896_s23 + $0xf0] ss:$8 sps:$4 sm:$0xff]  }
 0x25b   :  { %3523 = vmatpush1.bf16.msra.mxu0 %v5850_v2  ;;  %3605 = vmatpush1.bf16.msra.mxu1 %v5853_v3  ;;  %v5936_v2 = vld [vmem:[%s7896_s23 + $0x104] ss:$8 sps:$4 sm:$0xff]   ;;  %v5991_v3 = vmov 0  }
 0x25c   :  { %3524 = vmatprep.subr.bf16.mxu0 %v5858_v4  ;;  %3606 = vmatprep.subr.bf16.mxu1 %v5861_v5  ;;  %v5961_v4 = vld [vmem:[%s7870_s8] sm:$0xff]   ;;  %v5962_v5 = vld [vmem:[%s7870_s8 + $0x8] sm:$0xff]  }
 0x25f   :  { %3525 = vmatpush1.bf16.msra.mxu0 %v5856_v6  ;;  %3607 = vmatpush1.bf16.msra.mxu1 %v5859_v7  ;;  %v5963_v6 = vld [vmem:[%s7870_s8 + $0x10] sm:$0xff]   ;;  %v5964_v7 = vld [vmem:[%s7870_s8 + $0x18] sm:$0xff]  }
 0x260   :  { %3526 = vmatprep.subr.bf16.mxu0 %v5864_v8  ;;  %3608 = vmatprep.subr.bf16.mxu1 %v5867_v10  ;;  %v5965_v8 = vld [vmem:[%s7870_s8 + $0x20] sm:$0xff]   ;;  %v5966_v10 = vld [vmem:[%s7870_s8 + $0x28] sm:$0xff]  }
 0x263   :  { %3527 = vmatpush1.bf16.msra.mxu0 %v5862_v12  ;;  %3609 = vmatpush1.bf16.msra.mxu1 %v5865_v13  ;;  %v5967_v12 = vld [vmem:[%s7870_s8 + $0x30] sm:$0xff]   ;;  %v5968_v13 = vld [vmem:[%s7870_s8 + $0x38] sm:$0xff]  }
 0x264   :  { %3528 = vmatprep.subr.bf16.mxu0 %v5870_v14  ;;  %3610 = vmatprep.subr.bf16.mxu1 %v5873_v15  ;;  %v5969_v14 = vld [vmem:[%s7870_s8 + $0x40] sm:$0xff]   ;;  %v5970_v15 = vld [vmem:[%s7870_s8 + $0x48] sm:$0xff]  }
 0x267   :  { %3529 = vmatpush1.bf16.msra.mxu0 %v5868_v17  ;;  %3611 = vmatpush1.bf16.msra.mxu1 %v5871_v18  ;;  %v2949_v17 = vld [vmem:[%s7871_s5] sm:$0xf] }
 0x268   :  { %3530 = vmatprep.subr.bf16.mxu0 %v5876_v19  ;;  %3612 = vmatprep.subr.bf16.mxu1 %v5879_v20  ;;  %v2954_v18 = vrot.slane %v2949_v17, %v7437_v28  ;;  %v2958_v19 = vrot.slane %v2949_v17, %v7445_v31  ;;  %v2966_v20 = vrot.slane %v2949_v17, %v522_v33 }
 0x26b   :  { %3531 = vmatpush1.bf16.msra.mxu0 %v5874_v22  ;;  %3613 = vmatpush1.bf16.msra.mxu1 %v5877_v23 }
 0x26c   :  { %3532 = vmatprep.subr.bf16.mxu0 %v5882_v9  ;;  %3614 = vmatprep.subr.bf16.mxu1 %v5885_v26 }
 0x26f   :  { %3533 = vmatpush1.bf16.msra.mxu0 %v5880_v30  ;;  %3615 = vmatpush1.bf16.msra.mxu1 %v5883_v25 }
 0x270   :  { %3970 = vmatprep.subr.bf16.mxu0 %v5888_v34  ;;  %4175 = vmatprep.subr.bf16.mxu1 %v5991_v3 }
 0x272   :  { %3549 = vmatmul.mubr.bf16.vlgmr.msra.gmra.mrb[4].mxu0 %v2947_v37  ;;  %3631 = vmatmul.mubr.bf16.vlgmr.msra.gmra.mrb[4].mxu1 %v2947_v37 }
 0x273   :  { %3971 = vmatpush1.bf16.msra.mxu0 %v5886_v36  ;;  %4176 = vmatpush1.bf16.msra.mxu1 %v5961_v4  ;;  %v3705_v4 = vld [vmem:[%s7873_s7] sm:$0x3] }
 0x274   :  { %3972 = vmatprep.subr.bf16.mxu0 %v5891_v38  ;;  %4177 = vmatprep.subr.bf16.mxu1 %v5991_v3 }
 0x277   :  { %3973 = vmatpush1.bf16.msra.mxu0 %v5889_v29  ;;  %4178 = vmatpush1.bf16.msra.mxu1 %v5962_v5  ;;  %v3710_v5 = vrot.slane %v3705_v4, %v7437_v28  ;;  %v5974_v28 = vld [vmem:[%s7872_s10] sm:$0xff]  }
 0x278   :  { %3974 = vmatprep.subr.bf16.mxu0 %v5894_v39  ;;  %4179 = vmatprep.subr.bf16.mxu1 %v5991_v3 }
 0x27b   :  { %3975 = vmatpush1.bf16.msra.mxu0 %v5892_v40  ;;  %4180 = vmatpush1.bf16.msra.mxu1 %v5963_v6  ;;  %v3714_v6 = vrot.slane %v3705_v4, %v7445_v31  ;;  %v5975_v31 = vld [vmem:[%s7872_s10 + $0x8] sm:$0xff]   ;;  %v5073_v4 = vld [vmem:[%s7882_s17] ss:$0 sm:$0xff] }
 0x27c   :  { %3976 = vmatprep.subr.bf16.mxu0 %v5897_v41  ;;  %4181 = vmatprep.subr.bf16.mxu1 %v5991_v3 }
 0x27f   :  { %3977 = vmatpush1.bf16.msra.mxu0 %v5895_v42  ;;  %4182 = vmatpush1.bf16.msra.mxu1 %v5964_v7  ;;  %v5934_v42 = vld [vmem:[%s7896_s23 + $0x100] ss:$8 sps:$4 sm:$0xff]  }
 0x280   :  { %3978 = vmatprep.subr.bf16.mxu0 %v5900_v49  ;;  %4183 = vmatprep.subr.bf16.mxu1 %v5991_v3 }
 0x283   :  { %3979 = vmatpush1.bf16.msra.mxu0 %v5898_v44  ;;  %4184 = vmatpush1.bf16.msra.mxu1 %v5965_v8  ;;  %v5939_v44 = vld [vmem:[%s7896_s23 + $0x114] ss:$8 sps:$4 sm:$0xff]  }
 0x284   :  { %3980 = vmatprep.subr.bf16.mxu0 %v5903_v24  ;;  %4185 = vmatprep.subr.bf16.mxu1 %v5991_v3 }
 0x287   :  { %3981 = vmatpush1.bf16.msra.mxu0 %v5901_v45  ;;  %4186 = vmatpush1.bf16.msra.mxu1 %v5966_v10  ;;  %v5937_v45 = vld [vmem:[%s7896_s23 + $0x110] ss:$8 sps:$4 sm:$0xff]  }
 0x288   :  { %3982 = vmatprep.subr.bf16.mxu0 %v5906_v46  ;;  %4187 = vmatprep.subr.bf16.mxu1 %v5991_v3  ;;  %v5942_v46 = vld [vmem:[%s7896_s23 + $0x124] ss:$8 sps:$4 sm:$0xff]  }
 0x28b   :  { %3983 = vmatpush1.bf16.msra.mxu0 %v5904_v47  ;;  %4188 = vmatpush1.bf16.msra.mxu1 %v5967_v12  ;;  %v5940_v47 = vld [vmem:[%s7896_s23 + $0x120] ss:$8 sps:$4 sm:$0xff]  }
 0x28c   :  { %3984 = vmatprep.subr.bf16.mxu0 %v5909_v32  ;;  %4189 = vmatprep.subr.bf16.mxu1 %v5991_v3  ;;  %v5945_v32 = vld [vmem:[%s7896_s23 + $0x134] ss:$8 sps:$4 sm:$0xff]  }
 0x28f   :  { %3985 = vmatpush1.bf16.msra.mxu0 %v5907_v48  ;;  %4190 = vmatpush1.bf16.msra.mxu1 %v5968_v13  ;;  %v5943_v48 = vld [vmem:[%s7896_s23 + $0x130] ss:$8 sps:$4 sm:$0xff]  }
 0x290   :  { %3986 = vmatprep.subr.bf16.mxu0 %v5912_v50  ;;  %4191 = vmatprep.subr.bf16.mxu1 %v5991_v3  ;;  %v5948_v50 = vld [vmem:[%s7896_s23 + $0x144] ss:$8 sps:$4 sm:$0xff]  }
 0x293   :  { %3987 = vmatpush1.bf16.msra.mxu0 %v5910_v51  ;;  %4192 = vmatpush1.bf16.msra.mxu1 %v5969_v14  ;;  %v5946_v51 = vld [vmem:[%s7896_s23 + $0x140] ss:$8 sps:$4 sm:$0xff]  }
 0x294   :  { %3988 = vmatprep.subr.bf16.mxu0 %v5915_v52  ;;  %4193 = vmatprep.subr.bf16.mxu1 %v5991_v3  ;;  %v5951_v52 = vld [vmem:[%s7896_s23 + $0x154] ss:$8 sps:$4 sm:$0xff]  }
 0x297   :  { %3989 = vmatpush1.bf16.msra.mxu0 %v5913_v53  ;;  %4194 = vmatpush1.bf16.msra.mxu1 %v5970_v15  ;;  %v5949_v53 = vld [vmem:[%s7896_s23 + $0x150] ss:$8 sps:$4 sm:$0xff]  }
 0x298   :  { %3990 = vmatprep.subr.bf16.mxu0 %v5918_v54  ;;  %4195 = vmatprep.subr.bf16.mxu1 %v5991_v3  ;;  %v5954_v54 = vld [vmem:[%s7896_s23 + $0x164] ss:$8 sps:$4 sm:$0xff]  }
 0x29b   :  { %3991 = vmatpush1.bf16.msra.mxu0 %v5916_v55  ;;  %4196 = vmatpush1.bf16.msra.mxu1 %v5971_v16  ;;  %v2962_v55 = vrot.slane %v2949_v17, %v518_v11 }
 0x29c   :  { %3992 = vmatprep.subr.bf16.mxu0 %v5921_v56  ;;  %4197 = vmatprep.subr.bf16.mxu1 %v5991_v3  ;;  %v5952_v56 = vld [vmem:[%s7896_s23 + $0x160] ss:$8 sps:$4 sm:$0xff]  }
 0x29f   :  { %3993 = vmatpush1.bf16.msra.mxu0 %v5919_v57  ;;  %v5957_v57 = vld [vmem:[%s7896_s23 + $0x174] ss:$8 sps:$4 sm:$0xff]  }
 0x2a0   :  { %3994 = vmatprep.subr.bf16.mxu0 %v5924_v58 }
 0x2a3   :  { %3995 = vmatpush1.bf16.msra.mxu0 %v5922_v59  ;;  %v5955_v59 = vld [vmem:[%s7896_s23 + $0x170] ss:$8 sps:$4 sm:$0xff]  }
 0x2a4   :  { %3996 = vmatprep.subr.bf16.mxu0 %v5927_v60  ;;  %v5958_v60 = vld [vmem:[%s7896_s23 + $0x180] ss:$8 sps:$4 sm:$0xff]  }
 0x2a7   :  { %3997 = vmatpush1.bf16.msra.mxu0 %v5925_v61 }
 0x2a8   :  { %3998 = vmatprep.subr.bf16.mxu0 %v5930_v62 }
 0x2ab   :  { %3999 = vmatpush1.bf16.msra.mxu0 %v5928_v63  ;;  %v5972_v63 = vld [vmem:[%s7870_s8 + $0x58] sm:$0xff]  }
 0x2ac   :  { %4000 = vmatprep.subr.bf16.mxu0 %v5933_v0  ;;  %4198 = vmatpush1.bf16.msra.mxu1 %v5972_v63  ;;  %v5973_v0 = vld [vmem:[%s7870_s8 + $0x60] ss:$0 sps:$4 sm:$0xff]  }
 0x2ad   :  { %4199 = vmatprep.subr.bf16.mxu1 %v5991_v3 }
 0x2af   :  { %4001 = vmatpush1.bf16.msra.mxu0 %v5931_v1  ;;  %v4173_v1 = vsel %vm4171_vm11, %v5973_v0, 0 }
 0x2b0   :  { %4011 = vmatprep.subr.bf16.mxu0 %v5936_v2  ;;  %4200 = vmatpush1.bf16.msra.mxu1 %v4173_v1  ;;  %v5992_v2 = vmov 0.0  }
 0x2b1   :  { %5091 = vmatprep.subr.bf16.mxu1 %v5992_v2 }
 0x345   :  { %v3550_v21 = vpop.f32.mrb[4].mxu0  ;;  %v3632_v22 = vpop.f32.mrb[4].mxu1 }
 0x346   :  { %v5131_v23 = vadd.f32 %v3550_v21, %v2954_v18  ;;  %v3552_v9 = vpop.f32.mrb[5].mxu0  ;;  %v3634_v26 = vpop.f32.mrb[5].mxu1  ;;  %v5133_v58 = vadd.f32 %v3632_v22, %v2962_v55  ;;  %v5977_v21 = vld [vmem:[%s7872_s10 + $0x18] sm:$0xff]   ;;  %v5978_v22 = vld [vmem:[%s7872_s10 + $0x20] sm:$0xff]  }
 0x347   :  { %v5132_v27 = vadd.f32 %v3552_v9, %v2958_v19  ;;  %v5134_v30 = vadd.f32 %v3634_v26, %v2966_v20  ;;  %v3554_v25 = vpop.f32.mrb[6].mxu0  ;;  %v3636_v34 = vpop.f32.mrb[6].mxu1  ;;  %v5976_v20 = vld [vmem:[%s7872_s10 + $0x10] sm:$0xff]   ;;  %v5063_v55 = vld [vmem:[%s7879_s13] ss:$0 sm:$0xff] }
 0x348   :  { %vm3639_vm7 = vcmp.gt.f32.partialorder %v5131_v23, 0.0  ;;  %v3643_v35 = vmul.f32 0.01, %v5131_v23  ;;  %v3555_v29 = vpop.f32.mrb[7].mxu0  ;;  %v3637_v39 = vpop.f32.mrb[7].mxu1  ;;  %vm3641_vm10 = vcmp.gt.f32.partialorder %v5133_v58, 0.0 }
 0x349   :  { %vm3640_vm8 = vcmp.gt.f32.partialorder %v5132_v27, 0.0  ;;  %v3644_v36 = vmul.f32 0.01, %v5132_v27  ;;  %vm3642_vm9 = vcmp.gt.f32.partialorder %v5134_v30, 0.0  ;;  %v3646_v37 = vmul.f32 0.01, %v5134_v30 }
 0x34a   :  { %v3647_v38 = vsel %vm3639_vm7, %v5131_v23, %v3643_v35  ;;  %v3645_v11 = vmul.f32 0.01, %v5133_v58  ;;  %v5979_v23 = vld [vmem:[%s7872_s10 + $0x28] sm:$0xff]   ;;  %v5980_v9 = vld [vmem:[%s7872_s10 + $0x30] ss:$0 sps:$4 sm:$0x33]  }
 0x34b   :  { %v3650_v40 = vsel %vm3642_vm9, %v5134_v30, %v3646_v37  ;;  %v3648_v33 = vsel %vm3640_vm8, %v5132_v27, %v3644_v36  ;;  %v3701_v49 = vpack.c.bf16 %v3647_v38, %v3647_v38  ;;  %v4284_v26 = vsel %vm4282_vm15, %v5980_v9, 0  ;;  %v5039_v27 = vld [vmem:[%s7875_s9] ss:$0 sm:$0xff] }
 0x34c   :  { %v3702_v41 = vpack.c.bf16 %v3648_v33, %v3648_v33  ;;  %v3704_v24 = vpack.c.bf16 %v3650_v40, %v3650_v40  ;;  %v3649_v61 = vsel %vm3641_vm10, %v5133_v58, %v3645_v11  ;;  %v5981_v29 = vld [vmem:[%s7874_s12] sm:$0xff]   ;;  %v5982_v40 = vld [vmem:[%s7874_s12 + $0x8] sm:$0xff]   ;;  %v5983_v33 = vld [vmem:[%s7874_s12 + $0x10] sm:$0xff]   ;;  %vm4429_vm7 = vcmask 80896  }
 0x34d   :  { %v3703_v62 = vpack.c.bf16 %v3649_v61, %v3649_v61  ;;  %vm4497_vm8 = vcmask 33792   ;;  %vm4516_vm9 = vcmask 1024  }
 0x34e   :  { %4002 = vmatprep.mubr.bf16.mxu0 %v3702_v41  ;;  %v5984_v41 = vld [vmem:[%s7874_s12 + $0x18] ss:$0 sps:$4 sm:$0x11]  }
 0x34f   :  { %4003 = vmatmul.mubr.bf16.vlgmr.msra.gmra.mrb[8].mxu0 %v3701_v49  ;;  %v5054_v49 = vld [vmem:[%s7877_s11] ss:$0 sm:$0xff] }
 0x350   :  { %4012 = vmatpush1.bf16.msra.mxu0 %v5934_v42  ;;  %5038 = vmatprep.mubr.msk.bf16.mxu0 %vm3471_vm5, %v3704_v24  ;;  %v4371_v42 = vsel %vm4369_vm4, %v5984_v41, 0 }
 0x351   :  { %4013 = vmatprep.subr.bf16.mxu0 %v5939_v44 }
 0x354   :  { %4014 = vmatpush1.bf16.msra.mxu0 %v5937_v45 }
 0x355   :  { %4015 = vmatprep.subr.bf16.mxu0 %v5942_v46 }
 0x358   :  { %4016 = vmatpush1.bf16.msra.mxu0 %v5940_v47  ;;  %v5985_v47 = vld [vmem:[%s7876_s14] sm:$0x1f]  }
 0x359   :  { %4017 = vmatprep.subr.bf16.mxu0 %v5945_v32 }
 0x35c   :  { %4018 = vmatpush1.bf16.msra.mxu0 %v5943_v48 }
 0x35d   :  { %4019 = vmatprep.subr.bf16.mxu0 %v5948_v50 }
 0x360   :  { %4020 = vmatpush1.bf16.msra.mxu0 %v5946_v51 }
 0x361   :  { %4021 = vmatprep.subr.bf16.mxu0 %v5951_v52  ;;  %v4434_v52 = vsel %vm2328_vm1, %v5985_v47, 0  ;;  %vm4485_vm1 = vcmask 74752  }
 0x364   :  { %4022 = vmatpush1.bf16.msra.mxu0 %v5949_v53  ;;  %v4413_v53 = vld [vmem:[%s7878_s1] sm:$0x3] }
 0x365   :  { %4023 = vmatprep.subr.bf16.mxu0 %v5954_v54  ;;  %v4416_v54 = vpack.c.bf16 %v4413_v53, %v4413_v53 }
 0x368   :  { %4024 = vmatpush1.bf16.msra.mxu0 %v5952_v56 }
 0x369   :  { %4025 = vmatprep.subr.bf16.mxu0 %v5957_v57  ;;  %v5072_v57 = vld [vmem:[%s7880_s16] ss:$0 sm:$0xff] }
 0x36c   :  { %4026 = vmatpush1.bf16.msra.mxu0 %v5955_v59 }
 0x36d   :  { %4027 = vmatprep.subr.bf16.mxu0 %v5960_v43 }
 0x370   :  { %4028 = vmatpush1.bf16.msra.mxu0 %v5958_v60 }
 0x373   :  { %4044 = vmatmul.mubr.bf16.vlgmr.msra.gmra.mrb[8].mxu0 %v3703_v62  ;;  %v5069_v62 = vld [vmem:[%s7881_s15] ss:$0 sm:$0xff] }
 0x446   :  { %v4045_v7 = vpop.f32.mrb[8].mxu0 }
 0x447   :  { %v5135_v3 = vadd.f32 %v4045_v7, %v3710_v5  ;;  %v4047_v8 = vpop.f32.mrb[9].mxu0 }
 0x448   :  { %v5136_v10 = vadd.f32 %v4047_v8, %v3714_v6  ;;  %v4049_v12 = vpop.f32.mrb[10].mxu0  ;;  %v24_v8 = vstv %s7883_s18 }
 0x449   :  { %vm4052_vm12 = vcmp.gt.f32.partialorder %v5135_v3, 0.0  ;;  %v4054_v13 = vmul.f32 0.01, %v5135_v3  ;;  %v4050_v14 = vpop.f32.mrb[11].mxu0  ;;  %25 = vst [vmem:[#allocation2] sm:$0x1] %v24_v8 }
 0x44a   :  { %vm4053_vm13 = vcmp.gt.f32.partialorder %v5136_v10, 0.0  ;;  %v4055_v15 = vmul.f32 0.01, %v5136_v10 }
 0x44b   :  { %v4056_v16 = vsel %vm4052_vm12, %v5135_v3, %v4054_v13 }
 0x44c   :  { %v4057_v17 = vsel %vm4053_vm13, %v5136_v10, %v4055_v15  ;;  %v4083_v19 = vpack.c.bf16 %v4056_v16, %v4056_v16 }
 0x44d   :  { %v4084_v18 = vpack.c.bf16 %v4057_v17, %v4057_v17 }
 0x44f   :  { %5053 = vmatprep.mubr.msk.bf16.mxu1 %vm4167_vm14, %v4084_v18 }
 0x450   :  { %4208 = vmatmul.mubr.bf16.vlgmr.msra.gmra.mrb[8].mxu1 %v4083_v19  ;;  %v5074_v12 = vld [vmem:[#allocation2] ss:$0 sm:$0xff] }
 0x451   :  { %5092 = vmatpush3.bf16.msra.mxu1 %v5974_v28  ;;  %5105 = vmatprep.mubr.msk.bf16.mxu1 %vm5993_vm0, %v5992_v2 }
 0x452   :  { %5093 = vmatprep.subr.bf16.mxu1 %v5992_v2 }
 0x455   :  { %5094 = vmatpush3.bf16.msra.mxu1 %v5975_v31 }
 0x456   :  { %5095 = vmatprep.subr.bf16.mxu1 %v5992_v2 }
 0x459   :  { %5096 = vmatpush3.bf16.msra.mxu1 %v5976_v20 }
 0x45a   :  { %5097 = vmatprep.subr.bf16.mxu1 %v5992_v2 }
 0x45d   :  { %5098 = vmatpush3.bf16.msra.mxu1 %v5977_v21 }
 0x45e   :  { %5099 = vmatprep.subr.bf16.mxu1 %v5992_v2 }
 0x461   :  { %5100 = vmatpush3.bf16.msra.mxu1 %v5978_v22 }
 0x462   :  { %5101 = vmatprep.subr.bf16.mxu1 %v5992_v2 }
 0x465   :  { %5102 = vmatpush3.bf16.msra.mxu1 %v5979_v23 }
 0x466   :  { %5103 = vmatprep.subr.bf16.mxu1 %v5992_v2 }
 0x469   :  { %5104 = vmatpush3.bf16.msra.mxu1 %v4284_v26 }
 0x46a   :  { %5109 = vmatprep.subr.bf16.mxu1 %v5992_v2 }
 0x523   :  { %v4209_v30 = vpop.f32.mrb[8].mxu1 }
 0x524   :  { %v4210_v25 = vadd.f32 %v5039_v27, %v4209_v30  ;;  %v4211_v34 = vpop.f32.mrb[9].mxu1 }
 0x525   :  { %v4212_v35 = vpop.f32.mrb[10].mxu1 }
 0x526   :  { %vm4215_vm2 = vcmp.gt.f32.partialorder %v4210_v25, 0.0  ;;  %v4216_v36 = vmul.f32 0.01, %v4210_v25  ;;  %v4213_v37 = vpop.f32.mrb[11].mxu1 }
 0x528   :  { %v4217_v38 = vsel %vm4215_vm2, %v4210_v25, %v4216_v36 }
 0x529   :  { %v4231_v39 = vpack.c.bf16 %v4217_v38, %v4217_v38 }
 0x52b   :  { %5106 = vmatmul.mubr.msk.bf16.vlgmr.msra.gmra.mrb[12].mxu1 %vm4278_vm3, %v4231_v39 }
 0x52c   :  { %5110 = vmatpush3.bf16.msra.mxu1 %v5981_v29  ;;  %5117 = vmatprep.mubr.msk.bf16.mxu1 %vm5993_vm0, %v5992_v2 }
 0x52d   :  { %5111 = vmatprep.subr.bf16.mxu1 %v5992_v2 }
 0x530   :  { %5112 = vmatpush3.bf16.msra.mxu1 %v5982_v40 }
 0x531   :  { %5113 = vmatprep.subr.bf16.mxu1 %v5992_v2 }
 0x534   :  { %5114 = vmatpush3.bf16.msra.mxu1 %v5983_v33 }
 0x535   :  { %5115 = vmatprep.subr.bf16.mxu1 %v5992_v2 }
 0x538   :  { %5116 = vmatpush3.bf16.msra.mxu1 %v4371_v42 }
 0x539   :  { %5121 = vmatprep.subr.bf16.mxu1 %v5992_v2 }
 0x5fe   :  { %v4320_v44 = vpop.f32.mrb[12].mxu1 }
 0x5ff   :  { %v4321_v24 = vadd.f32 %v5054_v49, %v4320_v44  ;;  %v5107_v45 = vpop.f32.mrb[13].mxu1 }
 0x600   :  { %v4323_v46 = vpop.f32.mrb[14].mxu1 }
 0x601   :  { %vm4326_vm5 = vcmp.gt.f32.partialorder %v4321_v24, 0.0  ;;  %v4327_v32 = vmul.f32 0.01, %v4321_v24  ;;  %v5108_v48 = vpop.f32.mrb[15].mxu1 }
 0x603   :  { %v4328_v50 = vsel %vm4326_vm5, %v4321_v24, %v4327_v32 }
 0x604   :  { %v4336_v51 = vpack.c.bf16 %v4328_v50, %v4328_v50 }
 0x606   :  { %5118 = vmatmul.mubr.msk.bf16.vlgmr.msra.gmra.mrb[16].mxu1 %vm4365_vm6, %v4336_v51 }
 0x607   :  { %5122 = vmatpush3.bf16.msra.mxu1 %v4434_v52  ;;  %5123 = vmatprep.mubr.msk.bf16.mxu1 %vm5993_vm0, %v5992_v2 }
 0x60e   :  { %5124 = vmatmul.mubr.msk.bf16.vlgmr.msra.gmra.mrb[20].mxu1 %vm4429_vm7, %v4416_v54 }
 0x6d9   :  { %v4407_v56 = vpop.f32.mrb[16].mxu1 }
 0x6da   :  { %v4408_v58 = vadd.f32 %v5063_v55, %v4407_v56  ;;  %v5119_v59 = vpop.f32.mrb[17].mxu1 }
 0x6db   :  { %v4410_v43 = vpop.f32.mrb[18].mxu1 }
 0x6dc   :  { %v5120_v11 = vpop.f32.mrb[19].mxu1  ;;  %v4484_v60 = vmul.f32 %v5072_v57, %v4408_v58 }
 0x6de   :  { %v4486_v61 = vsel %vm4485_vm1, %v4484_v60, 0.0 }
 0x6df   :  { %4487 = vadd.xlane.f32.xlu0 %v4486_v61 }
 0x6e1   :  { %v4470_v63 = vpop.f32.mrb[20].mxu1 }
 0x6e2   :  { %v4471_v0 = vadd.f32 %v5069_v62, %v4470_v63  ;;  %v5125_v1 = vpop.f32.mrb[21].mxu1 }
 0x6e3   :  { %v4473_v2 = vpop.f32.mrb[22].mxu1 }
 0x6e4   :  { %v4476_v5 = vmax.f32 %v4471_v0, 0.0  ;;  %v5126_v6 = vpop.f32.mrb[23].mxu1 }
 0x6e6   :  { %v4496_v7 = vmul.f32 %v5073_v4, %v4476_v5 }
 0x6e8   :  { %v4498_v3 = vsel %vm4497_vm8, %v4496_v7, 0.0 }
 0x6e9   :  { %4499 = vadd.xlane.f32.xlu0 %v4498_v3 }
 0x76c   :  { %v4488_v10 = vpop.xlane.xlu0 %4487 }
 0x776   :  { %v4500_v13 = vpop.xlane.xlu0 %4499 }
 0x777   :  { %v4501_v14 = vadd.f32 %v4500_v13, %v4488_v10 }
 0x779   :  { %v4509_v15 = vadd.f32 %v5074_v12, %v4501_v14 }
 0x77b   :  { %v5075_v16 = vmul.f32 -1.442695, %v4509_v15 }
 0x77d   :  { %5986 = vpow2.f32 %v5075_v16 }
 0x787   :  { %v5987_v17 = vpop.eup %5986 }
 0x788   :  { %v4513_v18 = vadd.f32 1.0, %v5987_v17 }
 0x78a   :  { %5988 = vrcp.f32 %v4513_v18 }
 0x794   :  { %v5989_v28 = vpop.eup %5988 }
 0x795   :  { %4517 = vst.msk [vmem:[%s7884_s19] sm:$0x3] %vm4516_vm9, %v5989_v28 }

</bundles_post_ra>
